<compile_context>
chip_gen: v6e
topology: v6e:2x2x1
jax: 0.10.0
libtpu: 0.0.40
codegen_flags: <defaults>
</compile_context>

<pallas_src>
import functools

import jax
import jax.numpy as jnp
from jax import lax
from jax.experimental import pallas as pl
from jax.experimental.pallas import tpu as pltpu


def _lstm_tq_kernel(nv_ref, gx_ref, len_ref, h0_ref, c0_ref, whh_ref, wout_ref,
                    bout_ref, out_ref, h_scr, c_scr, *, hidden_dim, tile_t,
                    unroll):
    """One grid step == TILE_T LSTM time steps for one batch block.

    nv_ref:  (nb,) int32 SMEM        number of valid time blocks per batch block
    gx_ref:  (TILE_T, TILE_B, 4H) bf16  precomputed x @ W_ih^T + (b_ih + b_hh),
                                        gate order [i, f, o, g]
    len_ref: (TILE_B, 1) int32       sequence lengths
    h0/c0:   (TILE_B, H) f32         initial states
    whh_ref: (H, 4H) bf16            recurrent weight (resident), [i, f, o, g] cols
    wout:    (1, H) f32, bout: (1,1) output head
    out_ref: (TILE_B, 1) f32         sigmoid scores (written on last time block)
    h_scr/c_scr: (TILE_B, H) f32     carried LSTM state
    """
    b = pl.program_id(0)                      # batch-block index (parallel)
    tb = pl.program_id(1)                     # time-block index (arbitrary)
    H = hidden_dim
    t0 = tb * tile_t

    @pl.when(tb == 0)
    def _init():
        h_scr[...] = h0_ref[...]
        c_scr[...] = c0_ref[...]

    # Skip whole time blocks once every row in this batch block has finished.
    @pl.when(tb < nv_ref[b])
    def _run():
        lens = len_ref[...]                   # (TILE_B, 1) int32, hoisted
        whh = whh_ref[...]                    # (H, 4H) bf16, hoisted / resident

        def step(i, carry):
            h, c = carry                      # (TILE_B, H) f32
            # Only the recurrent matmul is on the serial critical path; gates_x
            # is streamed bf16 and upcast here (f32 accumulation on the MXU).
            gates = (gx_ref[i].astype(jnp.float32)
                     + jnp.dot(h.astype(whh.dtype), whh,
                               preferred_element_type=jnp.float32))  # (TILE_B, 4H)
            # Gate order [i, f, o, g]: one contiguous sigmoid + one tanh.
            sig = jax.nn.sigmoid(gates[:, :3 * H])
            i_g = sig[:, 0 * H:1 * H]
            f_g = sig[:, 1 * H:2 * H]
            o_g = sig[:, 2 * H:3 * H]
            g_g = jnp.tanh(gates[:, 3 * H:4 * H])
            c_new = f_g * c + i_g * g_g
            h_new = o_g * jnp.tanh(c_new)
            # pack_padded_sequence semantics: rows with lengths[b] <= t freeze.
            valid = lens > (t0 + i)           # (TILE_B, 1) bool
            return jnp.where(valid, h_new, h), jnp.where(valid, c_new, c)

        h, c = lax.fori_loop(0, tile_t, step, (h_scr[...], c_scr[...]),
                             unroll=unroll)
        h_scr[...] = h
        c_scr[...] = c

    @pl.when(tb == pl.num_programs(1) - 1)
    def _finalize():
        # Linear(H, 1) as a VPU/XLU lane-reduction (avoids an N=1 MXU matmul).
        logits = (jnp.sum(h_scr[...] * wout_ref[...], axis=-1, keepdims=True)
                  + bout_ref[...])
        out_ref[...] = jax.nn.sigmoid(logits)


def translation_quality_forward(tokens, lengths, h_init, c_init, params, *,
                                tile_t=32, tile_b=None,
                                vmem_budget_bytes=26 * 1024 * 1024):
    """Pallas implementation of translation_quality_model.forward.

    tokens:  (B, T) int32
    lengths: (B,)   int32
    h_init:  (1, B, H) float32
    c_init:  (1, B, H) float32
    returns: (B, 1) float32 sigmoid scores
    """
    We, w_ih, w_hh, b_ih, b_hh, w_out, b_out = (
        params["We"], params["w_ih"], params["w_hh"],
        params["b_ih"], params["b_hh"], params["w_out"], params["b_out"])

    B, T = tokens.shape
    H = w_hh.shape[1]                         # w_hh: (4H, H)
    E = We.shape[1]

    # ---- gate reorder: PyTorch [i, f, g, o] -> [i, f, o, g] (3 contiguous sigmoids)
    perm = jnp.concatenate([jnp.arange(0, 2 * H), jnp.arange(3 * H, 4 * H),
                            jnp.arange(2 * H, 3 * H)])
    w_ih_p = jnp.take(w_ih, perm, axis=0)                      # (4H, E)
    w_hh_p = jnp.take(w_hh, perm, axis=0)                      # (4H, H)
    bias_p = jnp.take((b_ih + b_hh).astype(jnp.float32), perm, axis=0)

    # ---- batch tiling: fill the MXU M-dimension; pad batch to a tile_b multiple
    b8 = -(-B // 8) * 8
    if tile_b is None:
        tile_b = min(128, b8)                 # target 128 rows/step when possible
    tile_b = max(8, min(-(-int(tile_b) // 8) * 8, b8))
    B_pad = -(-B // tile_b) * tile_b
    nb = B_pad // tile_b                      # >= 2 automatically when B_pad >= 256

    # ---- trim T to max(lengths) when lengths is concrete (exact, not approximate)
    T_eff = T
    try:
        T_eff = max(1, min(T, int(jnp.max(lengths))))
    except Exception:                         # traced lengths -> keep full T
        pass

    # ---- time tiling + VMEM budget (gates_x is bf16, double-buffered)
    tile_t = max(1, min(int(tile_t), T_eff))

    def _vmem_est(tt):
        return (2 * tt * tile_b * 4 * H * 2           # gates_x blocks (bf16, 2 bufs)
                + 2 * H * 4 * H * 2                   # W_hh^T (bf16, 2 bufs)
                + (2 * 2 + 2) * tile_b * H * 4        # h0/c0 inputs + h/c scratch
                + (1 << 16))                          # misc small blocks

    while tile_t > 8 and _vmem_est(tile_t) > vmem_budget_bytes:
        tile_t = max(8, tile_t // 2)
    T_pad = -(-T_eff // tile_t) * tile_t
    nt = T_pad // tile_t

    # ---- pad batch (padded rows have length 0 and never update / are skipped)
    tokens_p = jnp.zeros((B_pad, T_eff), jnp.int32).at[:B].set(
        tokens[:, :T_eff].astype(jnp.int32))
    lengths_i = lengths.astype(jnp.int32)
    lengths_p = jnp.zeros((B_pad, 1), jnp.int32).at[:B, 0].set(lengths_i)
    h0 = jnp.zeros((B_pad, H), jnp.float32).at[:B].set(
        h_init.reshape(B, H).astype(jnp.float32))
    c0 = jnp.zeros((B_pad, H), jnp.float32).at[:B].set(
        c_init.reshape(B, H).astype(jnp.float32))

    # ---- per-batch-block number of valid time blocks (scalar-prefetched to SMEM)
    block_max = jnp.max(lengths_p.reshape(nb, tile_b), axis=1)
    nvalid = ((block_max + tile_t - 1) // tile_t).astype(jnp.int32)   # (nb,)

    # ---- hoisted input projection: one 2-D bf16 MXU matmul, f32 accumulation,
    #      stored bf16 (halves the dominant HBM stream), time-major layout.
    emb_t = jnp.take(We.astype(jnp.bfloat16), tokens_p.T, axis=0)     # (T_eff, B_pad, E)
    gx2 = jnp.dot(emb_t.reshape(T_eff * B_pad, E),
                  w_ih_p.T.astype(jnp.bfloat16),
                  preferred_element_type=jnp.float32) + bias_p        # (T_eff*B_pad, 4H)
    gates_x = gx2.astype(jnp.bfloat16).reshape(T_eff, B_pad, 4 * H)
    gates_x = jnp.pad(gates_x, ((0, T_pad - T_eff), (0, 0), (0, 0)))

    whh_t = w_hh_p.T.astype(jnp.bfloat16)             # (H, 4H) bf16 resident weight
    wout_row = w_out.reshape(1, H).astype(jnp.float32)
    bout = b_out.reshape(1, 1).astype(jnp.float32)

    kernel = functools.partial(_lstm_tq_kernel, hidden_dim=H, tile_t=tile_t,
                               unroll=min(8, tile_t))

    def gx_map(b, t, nv):
        # Clamp the time-block index for finished blocks: the revisited block is
        # not re-DMA'd, so dead time blocks cost neither DMA nor compute.
        return (jnp.minimum(t, jnp.maximum(nv[b] - 1, 0)), b, 0)

    out = pl.pallas_call(
        kernel,
        out_shape=jax.ShapeDtypeStruct((B_pad, 1), jnp.float32),
        grid_spec=pltpu.PrefetchScalarGridSpec(
            num_scalar_prefetch=1,
            grid=(nb, nt),
            in_specs=[
                pl.BlockSpec((tile_t, tile_b, 4 * H), gx_map),               # gates_x (bf16)
                pl.BlockSpec((tile_b, 1), lambda b, t, nv: (b, 0)),          # lengths
                pl.BlockSpec((tile_b, H), lambda b, t, nv: (b, 0)),          # h0
                pl.BlockSpec((tile_b, H), lambda b, t, nv: (b, 0)),          # c0
                pl.BlockSpec((H, 4 * H), lambda b, t, nv: (0, 0)),           # W_hh^T (bf16)
                pl.BlockSpec((1, H), lambda b, t, nv: (0, 0)),               # w_out row
                pl.BlockSpec((1, 1), lambda b, t, nv: (0, 0)),               # b_out
            ],
            out_specs=pl.BlockSpec((tile_b, 1), lambda b, t, nv: (b, 0)),
            scratch_shapes=[pltpu.VMEM((tile_b, H), jnp.float32),   # h state
                            pltpu.VMEM((tile_b, H), jnp.float32)],  # c state
        ),
        compiler_params=pltpu.CompilerParams(
            dimension_semantics=("parallel", "arbitrary"),
            vmem_limit_bytes=32 * 1024 * 1024),
    )(nvalid, gates_x, lengths_p, h0, c0, whh_t, wout_row, bout)
    return out[:B]


def reference_forward(tokens, lengths, h_init, c_init, params, *,
                      mirror_kernel=False):
    """Pure-JAX reference (lax.scan).  mirror_kernel=True mirrors the kernel's
    bf16 input projection / bf16 gates_x storage / bf16 recurrent-matmul
    operands (f32 accumulation) for a tight structural check."""
    We, w_ih, w_hh, b_ih, b_hh, w_out, b_out = (
        params["We"], params["w_ih"], params["w_hh"],
        params["b_ih"], params["b_hh"], params["w_out"], params["b_out"])
    B, T = tokens.shape
    H = w_hh.shape[1]
    bias = (b_ih + b_hh).astype(jnp.float32)

    if mirror_kernel:
        emb = jnp.take(We.astype(jnp.bfloat16), tokens, axis=0)        # (B, T, E)
        gx_all = jnp.einsum("bte,ge->btg", emb, w_ih.astype(jnp.bfloat16),
                            preferred_element_type=jnp.float32) + bias
        gx_all = gx_all.astype(jnp.bfloat16).astype(jnp.float32)
        whh_t = w_hh.T.astype(jnp.bfloat16)
    else:
        emb = jnp.take(We, tokens, axis=0).astype(jnp.float32)
        gx_all = jnp.einsum("bte,ge->btg", emb, w_ih.astype(jnp.float32)) + bias
        whh_t = w_hh.T.astype(jnp.float32)

    h = h_init.reshape(B, H).astype(jnp.float32)
    c = c_init.reshape(B, H).astype(jnp.float32)

    def step(carry, t):
        h, c = carry
        gates = gx_all[:, t, :] + jnp.dot(h.astype(whh_t.dtype), whh_t,
                                          preferred_element_type=jnp.float32)
        i_g = jax.nn.sigmoid(gates[:, 0 * H:1 * H])
        f_g = jax.nn.sigmoid(gates[:, 1 * H:2 * H])
        g_g = jnp.tanh(gates[:, 2 * H:3 * H])
        o_g = jax.nn.sigmoid(gates[:, 3 * H:4 * H])
        c_new = f_g * c + i_g * g_g
        h_new = o_g * jnp.tanh(c_new)
        valid = (lengths > t)[:, None]
        return (jnp.where(valid, h_new, h), jnp.where(valid, c_new, c)), None

    (h, _), _ = lax.scan(step, (h, c), jnp.arange(T))
    return jax.nn.sigmoid(h @ w_out.T + b_out)


if __name__ == "__main__":
    # Small shapes; H=128 keeps gate slices lane-aligned.  B=10 with tile_b=8
    # gives 2 batch blocks with different max lengths, exercising the
    # scalar-prefetched time-block skip, the clamped gates_x index_map, time
    # padding, and the cross-grid-step state carry.
    B, T, V, E, H = 10, 13, 50, 32, 128

    key = jax.random.PRNGKey(0)
    k_we, k_ih, k_hh, k_bih, k_bhh, k_wo, k_bo, k_tok = jax.random.split(key, 8)

    scale = 1.0 / jnp.sqrt(H)
    params = {
        "We":    jax.random.normal(k_we, (V, E), jnp.float32) * 0.1,  # We_vocab
        "w_ih":  jax.random.uniform(k_ih,  (4 * H, E), jnp.float32, -scale, scale),
        "w_hh":  jax.random.uniform(k_hh,  (4 * H, H), jnp.float32, -scale, scale),
        "b_ih":  jax.random.uniform(k_bih, (4 * H,),   jnp.float32, -scale, scale),
        "b_hh":  jax.random.uniform(k_bhh, (4 * H,),   jnp.float32, -scale, scale),
        "w_out": jax.random.uniform(k_wo,  (1, H),     jnp.float32, -scale, scale),
        "b_out": jax.random.uniform(k_bo,  (1,),       jnp.float32, -scale, scale),
    }

    tokens = jax.random.randint(k_tok, (B, T), 0, V, dtype=jnp.int32)
    lengths = jnp.array([13, 11, 9, 12, 10, 7, 5, 6, 3, 4], dtype=jnp.int32)
    h_init = jnp.zeros((1, B, H), jnp.float32)   # init__hidden()
    c_init = jnp.zeros((1, B, H), jnp.float32)

    # Config 1: explicit small tiles -> 2 batch blocks x 2 time blocks (skip path).
    out1 = jax.block_until_ready(
        translation_quality_forward(tokens, lengths, h_init, c_init, params,
                                    tile_t=8, tile_b=8))
    # Config 2: automatic tiling (single batch block, single trimmed time block).
    out2 = jax.block_until_ready(
        translation_quality_forward(tokens, lengths, h_init, c_init, params))

    ref_match = reference_forward(tokens, lengths, h_init, c_init, params,
                                  mirror_kernel=True)
    ref_f32 = reference_forward(tokens, lengths, h_init, c_init, params)

    for name, out in (("tiled", out1), ("auto", out2)):
        assert out.shape == (B, 1), (name, out.shape)
        err_match = float(jnp.max(jnp.abs(out - ref_match)))
        assert err_match < 3e-3, f"{name}: mismatch vs bf16-matched ref: {err_match}"
        err_f32 = float(jnp.max(jnp.abs(out - ref_f32)))
        assert err_f32 < 8e-2, f"{name}: mismatch vs f32 reference: {err_f32}"

    print("KERNEL_OK")
</pallas_src>

<mosaic_0001>
module attributes {stable_mosaic.version = 11 : i64} {
  func.func @_lstm_tq_kernel(%arg0: i32, %arg1: i32, %arg2: memref<2xi32, #tpu.memory_space<smem>>, %arg3: memref<8x8x512xbf16, #tpu.memory_space<vmem>>, %arg4: memref<8x1xi32, #tpu.memory_space<vmem>>, %arg5: memref<8x128xf32, #tpu.memory_space<vmem>>, %arg6: memref<8x128xf32, #tpu.memory_space<vmem>>, %arg7: memref<128x512xbf16, #tpu.memory_space<vmem>>, %arg8: memref<1x128xf32, #tpu.memory_space<vmem>>, %arg9: memref<1x1xf32, #tpu.memory_space<vmem>>, %arg10: memref<8x1xf32, #tpu.memory_space<vmem>>, %arg11: memref<8x128xf32, #tpu.memory_space<vmem>>, %arg12: memref<8x128xf32, #tpu.memory_space<vmem>>) attributes {dimension_semantics = [#tpu.dimension_semantics<parallel>, #tpu.dimension_semantics<arbitrary>], iteration_bounds = array<i64: 2, 2>, scalar_prefetch = 1 : i64, scratch_operands = 2 : i64, tpu.core_type = #tpu.core_type<tc>, window_params = [{transform_indices = @transform_0, window_bounds = array<i64: 8, 8, 512>}, {transform_indices = @transform_1, window_bounds = array<i64: 8, 1>}, {transform_indices = @transform_2, window_bounds = array<i64: 8, 128>}, {transform_indices = @transform_3, window_bounds = array<i64: 8, 128>}, {pipeline_mode = #tpu.pipeline_mode<synchronous>, transform_indices = @transform_4, window_bounds = array<i64: 128, 512>}, {pipeline_mode = #tpu.pipeline_mode<synchronous>, transform_indices = @transform_5, window_bounds = array<i64: 1, 128>}, {pipeline_mode = #tpu.pipeline_mode<synchronous>, transform_indices = @transform_6, window_bounds = array<i64: 1, 1>}, {transform_indices = @transform_7, window_bounds = array<i64: 8, 1>}]} {
    %c8_i32 = arith.constant 8 : i32
    %0 = arith.muli %arg1, %c8_i32 : i32
    %c0_i32 = arith.constant 0 : i32
    %1 = arith.cmpi eq, %arg1, %c0_i32 : i32
    %2 = arith.extui %1 : i1 to i32
    %c0_i32_0 = arith.constant 0 : i32
    %3 = arith.cmpi ne, %2, %c0_i32_0 : i32
    scf.if %3 {
      %c0 = arith.constant 0 : index
      %c0_3 = arith.constant 0 : index
      %12 = vector.load %arg5[%c0, %c0_3] : memref<8x128xf32, #tpu.memory_space<vmem>>, vector<8x128xf32>
      %c0_4 = arith.constant 0 : index
      %c0_5 = arith.constant 0 : index
      %13 = vector.load %arg11[%c0_4, %c0_5] : memref<8x128xf32, #tpu.memory_space<vmem>>, vector<8x128xf32>
      tpu.vector_store %arg11[%c0_4, %c0_5], %12 {strides = array<i32>} : memref<8x128xf32, #tpu.memory_space<vmem>>, vector<8x128xf32>,
      %c0_6 = arith.constant 0 : index
      %c0_7 = arith.constant 0 : index
      %14 = vector.load %arg6[%c0_6, %c0_7] : memref<8x128xf32, #tpu.memory_space<vmem>>, vector<8x128xf32>
      %c0_8 = arith.constant 0 : index
      %c0_9 = arith.constant 0 : index
      %15 = vector.load %arg12[%c0_8, %c0_9] : memref<8x128xf32, #tpu.memory_space<vmem>>, vector<8x128xf32>
      tpu.vector_store %arg12[%c0_8, %c0_9], %14 {strides = array<i32>} : memref<8x128xf32, #tpu.memory_space<vmem>>, vector<8x128xf32>,
    } else {
    }
    %4 = arith.index_cast %arg0 : i32 to index
    %5 = memref.load %arg2[%4] : memref<2xi32, #tpu.memory_space<smem>>
    %6 = arith.cmpi slt, %arg1, %5 : i32
    %7 = arith.extui %6 : i1 to i32
    %c0_i32_1 = arith.constant 0 : i32
    %8 = arith.cmpi ne, %7, %c0_i32_1 : i32
    scf.if %8 {
      %c0 = arith.constant 0 : index
      %c0_3 = arith.constant 0 : index
      %12 = vector.load %arg4[%c0, %c0_3] : memref<8x1xi32, #tpu.memory_space<vmem>>, vector<8x1xi32>
      %c0_4 = arith.constant 0 : index
      %c0_5 = arith.constant 0 : index
      %13 = vector.load %arg7[%c0_4, %c0_5] : memref<128x512xbf16, #tpu.memory_space<vmem>>, vector<128x512xbf16>
      %c0_6 = arith.constant 0 : index
      %c0_7 = arith.constant 0 : index
      %14 = vector.load %arg11[%c0_6, %c0_7] : memref<8x128xf32, #tpu.memory_space<vmem>>, vector<8x128xf32>
      %c0_8 = arith.constant 0 : index
      %c0_9 = arith.constant 0 : index
      %15 = vector.load %arg12[%c0_8, %c0_9] : memref<8x128xf32, #tpu.memory_space<vmem>>, vector<8x128xf32>
      %c0_i32_10 = arith.constant 0 : i32
      %16 = arith.index_cast %c0_i32_10 : i32 to index
      %c0_11 = arith.constant 0 : index
      %c0_12 = arith.constant 0 : index
      %17 = vector.load %arg3[%16, %c0_11, %c0_12] : memref<8x8x512xbf16, #tpu.memory_space<vmem>>, vector<1x8x512xbf16>
      %18 = vector.shape_cast %17 : vector<1x8x512xbf16> to vector<8x512xbf16>
      %19 = arith.extf %18 : vector<8x512xbf16> to vector<8x512xf32>
      %20 = arith.truncf %14 : vector<8x128xf32> to vector<8x128xbf16>
      %cst = arith.constant dense<0.000000e+00> : vector<8x512xf32>
      %21 = tpu.matmul %20, %13, %cst {dimension_numbers = #tpu.dot_dimension_numbers<[1], [0], [0], [1], [0, 0, 1, 1], [], []>} : vector<8x128xbf16>, vector<128x512xbf16>, vector<8x512xf32> -> vector<8x512xf32>
      %22 = arith.addf %19, %21 : vector<8x512xf32>
      %23 = vector.extract_strided_slice %22 {offsets = [0, 0], sizes = [8, 384], strides = [1, 1]} : vector<8x512xf32> to vector<8x384xf32>
      %24 = arith.negf %23 : vector<8x384xf32>
      %25 = math.exp %24 : vector<8x384xf32>
      %cst_13 = arith.constant 1.000000e+00 : f32
      %26 = vector.broadcast %cst_13 : f32 to vector<8x384xf32>
      %27 = arith.addf %26, %25 : vector<8x384xf32>
      %28 = arith.divf %26, %27 : vector<8x384xf32>
      %29 = vector.extract_strided_slice %28 {offsets = [0, 0], sizes = [8, 128], strides = [1, 1]} : vector<8x384xf32> to vector<8x128xf32>
      %30 = vector.extract_strided_slice %28 {offsets = [0, 128], sizes = [8, 128], strides = [1, 1]} : vector<8x384xf32> to vector<8x128xf32>
      %31 = vector.extract_strided_slice %28 {offsets = [0, 256], sizes = [8, 128], strides = [1, 1]} : vector<8x384xf32> to vector<8x128xf32>
      %32 = vector.extract_strided_slice %22 {offsets = [0, 384], sizes = [8, 128], strides = [1, 1]} : vector<8x512xf32> to vector<8x128xf32>
      %33 = math.tanh %32 : vector<8x128xf32>
      %34 = arith.mulf %30, %15 : vector<8x128xf32>
      %35 = arith.mulf %29, %33 : vector<8x128xf32>
      %36 = arith.addf %34, %35 : vector<8x128xf32>
      %37 = math.tanh %36 : vector<8x128xf32>
      %38 = arith.mulf %31, %37 : vector<8x128xf32>
      %39 = arith.addi %0, %c0_i32_10 : i32
      %40 = vector.broadcast %39 : i32 to vector<8x1xi32>
      %41 = arith.cmpi sgt, %12, %40 : vector<8x1xi32>
      %42 = vector.shape_cast %41 : vector<8x1xi1> to vector<8x1xi1>
      %43 = vector.broadcast %42 : vector<8x1xi1> to vector<8x128xi1>
      %44 = arith.select %43, %38, %14 : vector<8x128xi1>, vector<8x128xf32>
      %45 = vector.shape_cast %41 : vector<8x1xi1> to vector<8x1xi1>
      %46 = vector.broadcast %45 : vector<8x1xi1> to vector<8x128xi1>
      %47 = arith.select %46, %36, %15 : vector<8x128xi1>, vector<8x128xf32>
      %c1_i32_14 = arith.constant 1 : i32
      %48 = arith.index_cast %c1_i32_14 : i32 to index
      %c0_15 = arith.constant 0 : index
      %c0_16 = arith.constant 0 : index
      %49 = vector.load %arg3[%48, %c0_15, %c0_16] : memref<8x8x512xbf16, #tpu.memory_space<vmem>>, vector<1x8x512xbf16>
      %50 = vector.shape_cast %49 : vector<1x8x512xbf16> to vector<8x512xbf16>
      %51 = arith.extf %50 : vector<8x512xbf16> to vector<8x512xf32>
      %52 = arith.truncf %44 : vector<8x128xf32> to vector<8x128xbf16>
      %cst_17 = arith.constant dense<0.000000e+00> : vector<8x512xf32>
      %53 = tpu.matmul %52, %13, %cst_17 {dimension_numbers = #tpu.dot_dimension_numbers<[1], [0], [0], [1], [0, 0, 1, 1], [], []>} : vector<8x128xbf16>, vector<128x512xbf16>, vector<8x512xf32> -> vector<8x512xf32>
      %54 = arith.addf %51, %53 : vector<8x512xf32>
      %55 = vector.extract_strided_slice %54 {offsets = [0, 0], sizes = [8, 384], strides = [1, 1]} : vector<8x512xf32> to vector<8x384xf32>
      %56 = arith.negf %55 : vector<8x384xf32>
      %57 = math.exp %56 : vector<8x384xf32>
      %cst_18 = arith.constant 1.000000e+00 : f32
      %58 = vector.broadcast %cst_18 : f32 to vector<8x384xf32>
      %59 = arith.addf %58, %57 : vector<8x384xf32>
      %60 = arith.divf %58, %59 : vector<8x384xf32>
      %61 = vector.extract_strided_slice %60 {offsets = [0, 0], sizes = [8, 128], strides = [1, 1]} : vector<8x384xf32> to vector<8x128xf32>
      %62 = vector.extract_strided_slice %60 {offsets = [0, 128], sizes = [8, 128], strides = [1, 1]} : vector<8x384xf32> to vector<8x128xf32>
      %63 = vector.extract_strided_slice %60 {offsets = [0, 256], sizes = [8, 128], strides = [1, 1]} : vector<8x384xf32> to vector<8x128xf32>
      %64 = vector.extract_strided_slice %54 {offsets = [0, 384], sizes = [8, 128], strides = [1, 1]} : vector<8x512xf32> to vector<8x128xf32>
      %65 = math.tanh %64 : vector<8x128xf32>
      %66 = arith.mulf %62, %47 : vector<8x128xf32>
      %67 = arith.mulf %61, %65 : vector<8x128xf32>
      %68 = arith.addf %66, %67 : vector<8x128xf32>
      %69 = math.tanh %68 : vector<8x128xf32>
      %70 = arith.mulf %63, %69 : vector<8x128xf32>
      %71 = arith.addi %0, %c1_i32_14 : i32
      %72 = vector.broadcast %71 : i32 to vector<8x1xi32>
      %73 = arith.cmpi sgt, %12, %72 : vector<8x1xi32>
      %74 = vector.shape_cast %73 : vector<8x1xi1> to vector<8x1xi1>
      %75 = vector.broadcast %74 : vector<8x1xi1> to vector<8x128xi1>
      %76 = arith.select %75, %70, %44 : vector<8x128xi1>, vector<8x128xf32>
      %77 = vector.shape_cast %73 : vector<8x1xi1> to vector<8x1xi1>
      %78 = vector.broadcast %77 : vector<8x1xi1> to vector<8x128xi1>
      %79 = arith.select %78, %68, %47 : vector<8x128xi1>, vector<8x128xf32>
      %c2_i32 = arith.constant 2 : i32
      %80 = arith.index_cast %c2_i32 : i32 to index
      %c0_19 = arith.constant 0 : index
      %c0_20 = arith.constant 0 : index
      %81 = vector.load %arg3[%80, %c0_19, %c0_20] : memref<8x8x512xbf16, #tpu.memory_space<vmem>>, vector<1x8x512xbf16>
      %82 = vector.shape_cast %81 : vector<1x8x512xbf16> to vector<8x512xbf16>
      %83 = arith.extf %82 : vector<8x512xbf16> to vector<8x512xf32>
      %84 = arith.truncf %76 : vector<8x128xf32> to vector<8x128xbf16>
      %cst_21 = arith.constant dense<0.000000e+00> : vector<8x512xf32>
      %85 = tpu.matmul %84, %13, %cst_21 {dimension_numbers = #tpu.dot_dimension_numbers<[1], [0], [0], [1], [0, 0, 1, 1], [], []>} : vector<8x128xbf16>, vector<128x512xbf16>, vector<8x512xf32> -> vector<8x512xf32>
      %86 = arith.addf %83, %85 : vector<8x512xf32>
      %87 = vector.extract_strided_slice %86 {offsets = [0, 0], sizes = [8, 384], strides = [1, 1]} : vector<8x512xf32> to vector<8x384xf32>
      %88 = arith.negf %87 : vector<8x384xf32>
      %89 = math.exp %88 : vector<8x384xf32>
      %cst_22 = arith.constant 1.000000e+00 : f32
      %90 = vector.broadcast %cst_22 : f32 to vector<8x384xf32>
      %91 = arith.addf %90, %89 : vector<8x384xf32>
      %92 = arith.divf %90, %91 : vector<8x384xf32>
      %93 = vector.extract_strided_slice %92 {offsets = [0, 0], sizes = [8, 128], strides = [1, 1]} : vector<8x384xf32> to vector<8x128xf32>
      %94 = vector.extract_strided_slice %92 {offsets = [0, 128], sizes = [8, 128], strides = [1, 1]} : vector<8x384xf32> to vector<8x128xf32>
      %95 = vector.extract_strided_slice %92 {offsets = [0, 256], sizes = [8, 128], strides = [1, 1]} : vector<8x384xf32> to vector<8x128xf32>
      %96 = vector.extract_strided_slice %86 {offsets = [0, 384], sizes = [8, 128], strides = [1, 1]} : vector<8x512xf32> to vector<8x128xf32>
      %97 = math.tanh %96 : vector<8x128xf32>
      %98 = arith.mulf %94, %79 : vector<8x128xf32>
      %99 = arith.mulf %93, %97 : vector<8x128xf32>
      %100 = arith.addf %98, %99 : vector<8x128xf32>
      %101 = math.tanh %100 : vector<8x128xf32>
      %102 = arith.mulf %95, %101 : vector<8x128xf32>
      %103 = arith.addi %0, %c2_i32 : i32
      %104 = vector.broadcast %103 : i32 to vector<8x1xi32>
      %105 = arith.cmpi sgt, %12, %104 : vector<8x1xi32>
      %106 = vector.shape_cast %105 : vector<8x1xi1> to vector<8x1xi1>
      %107 = vector.broadcast %106 : vector<8x1xi1> to vector<8x128xi1>
      %108 = arith.select %107, %102, %76 : vector<8x128xi1>, vector<8x128xf32>
      %109 = vector.shape_cast %105 : vector<8x1xi1> to vector<8x1xi1>
      %110 = vector.broadcast %109 : vector<8x1xi1> to vector<8x128xi1>
      %111 = arith.select %110, %100, %79 : vector<8x128xi1>, vector<8x128xf32>
      %c3_i32 = arith.constant 3 : i32
      %112 = arith.index_cast %c3_i32 : i32 to index
      %c0_23 = arith.constant 0 : index
      %c0_24 = arith.constant 0 : index
      %113 = vector.load %arg3[%112, %c0_23, %c0_24] : memref<8x8x512xbf16, #tpu.memory_space<vmem>>, vector<1x8x512xbf16>
      %114 = vector.shape_cast %113 : vector<1x8x512xbf16> to vector<8x512xbf16>
      %115 = arith.extf %114 : vector<8x512xbf16> to vector<8x512xf32>
      %116 = arith.truncf %108 : vector<8x128xf32> to vector<8x128xbf16>
      %cst_25 = arith.constant dense<0.000000e+00> : vector<8x512xf32>
      %117 = tpu.matmul %116, %13, %cst_25 {dimension_numbers = #tpu.dot_dimension_numbers<[1], [0], [0], [1], [0, 0, 1, 1], [], []>} : vector<8x128xbf16>, vector<128x512xbf16>, vector<8x512xf32> -> vector<8x512xf32>
      %118 = arith.addf %115, %117 : vector<8x512xf32>
      %119 = vector.extract_strided_slice %118 {offsets = [0, 0], sizes = [8, 384], strides = [1, 1]} : vector<8x512xf32> to vector<8x384xf32>
      %120 = arith.negf %119 : vector<8x384xf32>
      %121 = math.exp %120 : vector<8x384xf32>
      %cst_26 = arith.constant 1.000000e+00 : f32
      %122 = vector.broadcast %cst_26 : f32 to vector<8x384xf32>
      %123 = arith.addf %122, %121 : vector<8x384xf32>
      %124 = arith.divf %122, %123 : vector<8x384xf32>
      %125 = vector.extract_strided_slice %124 {offsets = [0, 0], sizes = [8, 128], strides = [1, 1]} : vector<8x384xf32> to vector<8x128xf32>
      %126 = vector.extract_strided_slice %124 {offsets = [0, 128], sizes = [8, 128], strides = [1, 1]} : vector<8x384xf32> to vector<8x128xf32>
      %127 = vector.extract_strided_slice %124 {offsets = [0, 256], sizes = [8, 128], strides = [1, 1]} : vector<8x384xf32> to vector<8x128xf32>
      %128 = vector.extract_strided_slice %118 {offsets = [0, 384], sizes = [8, 128], strides = [1, 1]} : vector<8x512xf32> to vector<8x128xf32>
      %129 = math.tanh %128 : vector<8x128xf32>
      %130 = arith.mulf %126, %111 : vector<8x128xf32>
      %131 = arith.mulf %125, %129 : vector<8x128xf32>
      %132 = arith.addf %130, %131 : vector<8x128xf32>
      %133 = math.tanh %132 : vector<8x128xf32>
      %134 = arith.mulf %127, %133 : vector<8x128xf32>
      %135 = arith.addi %0, %c3_i32 : i32
      %136 = vector.broadcast %135 : i32 to vector<8x1xi32>
      %137 = arith.cmpi sgt, %12, %136 : vector<8x1xi32>
      %138 = vector.shape_cast %137 : vector<8x1xi1> to vector<8x1xi1>
      %139 = vector.broadcast %138 : vector<8x1xi1> to vector<8x128xi1>
      %140 = arith.select %139, %134, %108 : vector<8x128xi1>, vector<8x128xf32>
      %141 = vector.shape_cast %137 : vector<8x1xi1> to vector<8x1xi1>
      %142 = vector.broadcast %141 : vector<8x1xi1> to vector<8x128xi1>
      %143 = arith.select %142, %132, %111 : vector<8x128xi1>, vector<8x128xf32>
      %c4_i32 = arith.constant 4 : i32
      %144 = arith.index_cast %c4_i32 : i32 to index
      %c0_27 = arith.constant 0 : index
      %c0_28 = arith.constant 0 : index
      %145 = vector.load %arg3[%144, %c0_27, %c0_28] : memref<8x8x512xbf16, #tpu.memory_space<vmem>>, vector<1x8x512xbf16>
      %146 = vector.shape_cast %145 : vector<1x8x512xbf16> to vector<8x512xbf16>
      %147 = arith.extf %146 : vector<8x512xbf16> to vector<8x512xf32>
      %148 = arith.truncf %140 : vector<8x128xf32> to vector<8x128xbf16>
      %cst_29 = arith.constant dense<0.000000e+00> : vector<8x512xf32>
      %149 = tpu.matmul %148, %13, %cst_29 {dimension_numbers = #tpu.dot_dimension_numbers<[1], [0], [0], [1], [0, 0, 1, 1], [], []>} : vector<8x128xbf16>, vector<128x512xbf16>, vector<8x512xf32> -> vector<8x512xf32>
      %150 = arith.addf %147, %149 : vector<8x512xf32>
      %151 = vector.extract_strided_slice %150 {offsets = [0, 0], sizes = [8, 384], strides = [1, 1]} : vector<8x512xf32> to vector<8x384xf32>
      %152 = arith.negf %151 : vector<8x384xf32>
      %153 = math.exp %152 : vector<8x384xf32>
      %cst_30 = arith.constant 1.000000e+00 : f32
      %154 = vector.broadcast %cst_30 : f32 to vector<8x384xf32>
      %155 = arith.addf %154, %153 : vector<8x384xf32>
      %156 = arith.divf %154, %155 : vector<8x384xf32>
      %157 = vector.extract_strided_slice %156 {offsets = [0, 0], sizes = [8, 128], strides = [1, 1]} : vector<8x384xf32> to vector<8x128xf32>
      %158 = vector.extract_strided_slice %156 {offsets = [0, 128], sizes = [8, 128], strides = [1, 1]} : vector<8x384xf32> to vector<8x128xf32>
      %159 = vector.extract_strided_slice %156 {offsets = [0, 256], sizes = [8, 128], strides = [1, 1]} : vector<8x384xf32> to vector<8x128xf32>
      %160 = vector.extract_strided_slice %150 {offsets = [0, 384], sizes = [8, 128], strides = [1, 1]} : vector<8x512xf32> to vector<8x128xf32>
      %161 = math.tanh %160 : vector<8x128xf32>
      %162 = arith.mulf %158, %143 : vector<8x128xf32>
      %163 = arith.mulf %157, %161 : vector<8x128xf32>
      %164 = arith.addf %162, %163 : vector<8x128xf32>
      %165 = math.tanh %164 : vector<8x128xf32>
      %166 = arith.mulf %159, %165 : vector<8x128xf32>
      %167 = arith.addi %0, %c4_i32 : i32
      %168 = vector.broadcast %167 : i32 to vector<8x1xi32>
      %169 = arith.cmpi sgt, %12, %168 : vector<8x1xi32>
      %170 = vector.shape_cast %169 : vector<8x1xi1> to vector<8x1xi1>
      %171 = vector.broadcast %170 : vector<8x1xi1> to vector<8x128xi1>
      %172 = arith.select %171, %166, %140 : vector<8x128xi1>, vector<8x128xf32>
      %173 = vector.shape_cast %169 : vector<8x1xi1> to vector<8x1xi1>
      %174 = vector.broadcast %173 : vector<8x1xi1> to vector<8x128xi1>
      %175 = arith.select %174, %164, %143 : vector<8x128xi1>, vector<8x128xf32>
      %c5_i32 = arith.constant 5 : i32
      %176 = arith.index_cast %c5_i32 : i32 to index
      %c0_31 = arith.constant 0 : index
      %c0_32 = arith.constant 0 : index
      %177 = vector.load %arg3[%176, %c0_31, %c0_32] : memref<8x8x512xbf16, #tpu.memory_space<vmem>>, vector<1x8x512xbf16>
      %178 = vector.shape_cast %177 : vector<1x8x512xbf16> to vector<8x512xbf16>
      %179 = arith.extf %178 : vector<8x512xbf16> to vector<8x512xf32>
      %180 = arith.truncf %172 : vector<8x128xf32> to vector<8x128xbf16>
      %cst_33 = arith.constant dense<0.000000e+00> : vector<8x512xf32>
      %181 = tpu.matmul %180, %13, %cst_33 {dimension_numbers = #tpu.dot_dimension_numbers<[1], [0], [0], [1], [0, 0, 1, 1], [], []>} : vector<8x128xbf16>, vector<128x512xbf16>, vector<8x512xf32> -> vector<8x512xf32>
      %182 = arith.addf %179, %181 : vector<8x512xf32>
      %183 = vector.extract_strided_slice %182 {offsets = [0, 0], sizes = [8, 384], strides = [1, 1]} : vector<8x512xf32> to vector<8x384xf32>
      %184 = arith.negf %183 : vector<8x384xf32>
      %185 = math.exp %184 : vector<8x384xf32>
      %cst_34 = arith.constant 1.000000e+00 : f32
      %186 = vector.broadcast %cst_34 : f32 to vector<8x384xf32>
      %187 = arith.addf %186, %185 : vector<8x384xf32>
      %188 = arith.divf %186, %187 : vector<8x384xf32>
      %189 = vector.extract_strided_slice %188 {offsets = [0, 0], sizes = [8, 128], strides = [1, 1]} : vector<8x384xf32> to vector<8x128xf32>
      %190 = vector.extract_strided_slice %188 {offsets = [0, 128], sizes = [8, 128], strides = [1, 1]} : vector<8x384xf32> to vector<8x128xf32>
      %191 = vector.extract_strided_slice %188 {offsets = [0, 256], sizes = [8, 128], strides = [1, 1]} : vector<8x384xf32> to vector<8x128xf32>
      %192 = vector.extract_strided_slice %182 {offsets = [0, 384], sizes = [8, 128], strides = [1, 1]} : vector<8x512xf32> to vector<8x128xf32>
      %193 = math.tanh %192 : vector<8x128xf32>
      %194 = arith.mulf %190, %175 : vector<8x128xf32>
      %195 = arith.mulf %189, %193 : vector<8x128xf32>
      %196 = arith.addf %194, %195 : vector<8x128xf32>
      %197 = math.tanh %196 : vector<8x128xf32>
      %198 = arith.mulf %191, %197 : vector<8x128xf32>
      %199 = arith.addi %0, %c5_i32 : i32
      %200 = vector.broadcast %199 : i32 to vector<8x1xi32>
      %201 = arith.cmpi sgt, %12, %200 : vector<8x1xi32>
      %202 = vector.shape_cast %201 : vector<8x1xi1> to vector<8x1xi1>
      %203 = vector.broadcast %202 : vector<8x1xi1> to vector<8x128xi1>
      %204 = arith.select %203, %198, %172 : vector<8x128xi1>, vector<8x128xf32>
      %205 = vector.shape_cast %201 : vector<8x1xi1> to vector<8x1xi1>
      %206 = vector.broadcast %205 : vector<8x1xi1> to vector<8x128xi1>
      %207 = arith.select %206, %196, %175 : vector<8x128xi1>, vector<8x128xf32>
      %c6_i32 = arith.constant 6 : i32
      %208 = arith.index_cast %c6_i32 : i32 to index
      %c0_35 = arith.constant 0 : index
      %c0_36 = arith.constant 0 : index
      %209 = vector.load %arg3[%208, %c0_35, %c0_36] : memref<8x8x512xbf16, #tpu.memory_space<vmem>>, vector<1x8x512xbf16>
      %210 = vector.shape_cast %209 : vector<1x8x512xbf16> to vector<8x512xbf16>
      %211 = arith.extf %210 : vector<8x512xbf16> to vector<8x512xf32>
      %212 = arith.truncf %204 : vector<8x128xf32> to vector<8x128xbf16>
      %cst_37 = arith.constant dense<0.000000e+00> : vector<8x512xf32>
      %213 = tpu.matmul %212, %13, %cst_37 {dimension_numbers = #tpu.dot_dimension_numbers<[1], [0], [0], [1], [0, 0, 1, 1], [], []>} : vector<8x128xbf16>, vector<128x512xbf16>, vector<8x512xf32> -> vector<8x512xf32>
      %214 = arith.addf %211, %213 : vector<8x512xf32>
      %215 = vector.extract_strided_slice %214 {offsets = [0, 0], sizes = [8, 384], strides = [1, 1]} : vector<8x512xf32> to vector<8x384xf32>
      %216 = arith.negf %215 : vector<8x384xf32>
      %217 = math.exp %216 : vector<8x384xf32>
      %cst_38 = arith.constant 1.000000e+00 : f32
      %218 = vector.broadcast %cst_38 : f32 to vector<8x384xf32>
      %219 = arith.addf %218, %217 : vector<8x384xf32>
      %220 = arith.divf %218, %219 : vector<8x384xf32>
      %221 = vector.extract_strided_slice %220 {offsets = [0, 0], sizes = [8, 128], strides = [1, 1]} : vector<8x384xf32> to vector<8x128xf32>
      %222 = vector.extract_strided_slice %220 {offsets = [0, 128], sizes = [8, 128], strides = [1, 1]} : vector<8x384xf32> to vector<8x128xf32>
      %223 = vector.extract_strided_slice %220 {offsets = [0, 256], sizes = [8, 128], strides = [1, 1]} : vector<8x384xf32> to vector<8x128xf32>
      %224 = vector.extract_strided_slice %214 {offsets = [0, 384], sizes = [8, 128], strides = [1, 1]} : vector<8x512xf32> to vector<8x128xf32>
      %225 = math.tanh %224 : vector<8x128xf32>
      %226 = arith.mulf %222, %207 : vector<8x128xf32>
      %227 = arith.mulf %221, %225 : vector<8x128xf32>
      %228 = arith.addf %226, %227 : vector<8x128xf32>
      %229 = math.tanh %228 : vector<8x128xf32>
      %230 = arith.mulf %223, %229 : vector<8x128xf32>
      %231 = arith.addi %0, %c6_i32 : i32
      %232 = vector.broadcast %231 : i32 to vector<8x1xi32>
      %233 = arith.cmpi sgt, %12, %232 : vector<8x1xi32>
      %234 = vector.shape_cast %233 : vector<8x1xi1> to vector<8x1xi1>
      %235 = vector.broadcast %234 : vector<8x1xi1> to vector<8x128xi1>
      %236 = arith.select %235, %230, %204 : vector<8x128xi1>, vector<8x128xf32>
      %237 = vector.shape_cast %233 : vector<8x1xi1> to vector<8x1xi1>
      %238 = vector.broadcast %237 : vector<8x1xi1> to vector<8x128xi1>
      %239 = arith.select %238, %228, %207 : vector<8x128xi1>, vector<8x128xf32>
      %c7_i32 = arith.constant 7 : i32
      %240 = arith.index_cast %c7_i32 : i32 to index
      %c0_39 = arith.constant 0 : index
      %c0_40 = arith.constant 0 : index
      %241 = vector.load %arg3[%240, %c0_39, %c0_40] : memref<8x8x512xbf16, #tpu.memory_space<vmem>>, vector<1x8x512xbf16>
      %242 = vector.shape_cast %241 : vector<1x8x512xbf16> to vector<8x512xbf16>
      %243 = arith.extf %242 : vector<8x512xbf16> to vector<8x512xf32>
      %244 = arith.truncf %236 : vector<8x128xf32> to vector<8x128xbf16>
      %cst_41 = arith.constant dense<0.000000e+00> : vector<8x512xf32>
      %245 = tpu.matmul %244, %13, %cst_41 {dimension_numbers = #tpu.dot_dimension_numbers<[1], [0], [0], [1], [0, 0, 1, 1], [], []>} : vector<8x128xbf16>, vector<128x512xbf16>, vector<8x512xf32> -> vector<8x512xf32>
      %246 = arith.addf %243, %245 : vector<8x512xf32>
      %247 = vector.extract_strided_slice %246 {offsets = [0, 0], sizes = [8, 384], strides = [1, 1]} : vector<8x512xf32> to vector<8x384xf32>
      %248 = arith.negf %247 : vector<8x384xf32>
      %249 = math.exp %248 : vector<8x384xf32>
      %cst_42 = arith.constant 1.000000e+00 : f32
      %250 = vector.broadcast %cst_42 : f32 to vector<8x384xf32>
      %251 = arith.addf %250, %249 : vector<8x384xf32>
      %252 = arith.divf %250, %251 : vector<8x384xf32>
      %253 = vector.extract_strided_slice %252 {offsets = [0, 0], sizes = [8, 128], strides = [1, 1]} : vector<8x384xf32> to vector<8x128xf32>
      %254 = vector.extract_strided_slice %252 {offsets = [0, 128], sizes = [8, 128], strides = [1, 1]} : vector<8x384xf32> to vector<8x128xf32>
      %255 = vector.extract_strided_slice %252 {offsets = [0, 256], sizes = [8, 128], strides = [1, 1]} : vector<8x384xf32> to vector<8x128xf32>
      %256 = vector.extract_strided_slice %246 {offsets = [0, 384], sizes = [8, 128], strides = [1, 1]} : vector<8x512xf32> to vector<8x128xf32>
      %257 = math.tanh %256 : vector<8x128xf32>
      %258 = arith.mulf %254, %239 : vector<8x128xf32>
      %259 = arith.mulf %253, %257 : vector<8x128xf32>
      %260 = arith.addf %258, %259 : vector<8x128xf32>
      %261 = math.tanh %260 : vector<8x128xf32>
      %262 = arith.mulf %255, %261 : vector<8x128xf32>
      %263 = arith.addi %0, %c7_i32 : i32
      %264 = vector.broadcast %263 : i32 to vector<8x1xi32>
      %265 = arith.cmpi sgt, %12, %264 : vector<8x1xi32>
      %266 = vector.shape_cast %265 : vector<8x1xi1> to vector<8x1xi1>
      %267 = vector.broadcast %266 : vector<8x1xi1> to vector<8x128xi1>
      %268 = arith.select %267, %262, %236 : vector<8x128xi1>, vector<8x128xf32>
      %269 = vector.shape_cast %265 : vector<8x1xi1> to vector<8x1xi1>
      %270 = vector.broadcast %269 : vector<8x1xi1> to vector<8x128xi1>
      %271 = arith.select %270, %260, %239 : vector<8x128xi1>, vector<8x128xf32>
      %c8_i32_43 = arith.constant 8 : i32
      %c0_44 = arith.constant 0 : index
      %c0_45 = arith.constant 0 : index
      %272 = vector.load %arg11[%c0_44, %c0_45] : memref<8x128xf32, #tpu.memory_space<vmem>>, vector<8x128xf32>
      tpu.vector_store %arg11[%c0_44, %c0_45], %268 {strides = array<i32>} : memref<8x128xf32, #tpu.memory_space<vmem>>, vector<8x128xf32>,
      %c0_46 = arith.constant 0 : index
      %c0_47 = arith.constant 0 : index
      %273 = vector.load %arg12[%c0_46, %c0_47] : memref<8x128xf32, #tpu.memory_space<vmem>>, vector<8x128xf32>
      tpu.vector_store %arg12[%c0_46, %c0_47], %271 {strides = array<i32>} : memref<8x128xf32, #tpu.memory_space<vmem>>, vector<8x128xf32>,
    } else {
    }
    %c1_i32 = arith.constant 1 : i32
    %9 = arith.cmpi eq, %arg1, %c1_i32 : i32
    %10 = arith.extui %9 : i1 to i32
    %c0_i32_2 = arith.constant 0 : i32
    %11 = arith.cmpi ne, %10, %c0_i32_2 : i32
    scf.if %11 {
      %c0 = arith.constant 0 : index
      %c0_3 = arith.constant 0 : index
      %12 = vector.load %arg11[%c0, %c0_3] : memref<8x128xf32, #tpu.memory_space<vmem>>, vector<8x128xf32>
      %c0_4 = arith.constant 0 : index
      %c0_5 = arith.constant 0 : index
      %13 = vector.load %arg8[%c0_4, %c0_5] : memref<1x128xf32, #tpu.memory_space<vmem>>, vector<1x128xf32>
      %14 = vector.broadcast %13 : vector<1x128xf32> to vector<8x128xf32>
      %15 = arith.mulf %12, %14 : vector<8x128xf32>
      %cst = arith.constant dense<0.000000e+00> : vector<8xf32>
      %16 = vector.multi_reduction <add>, %15, %cst [1] : vector<8x128xf32> to vector<8xf32>
      %17 = vector.shape_cast %16 : vector<8xf32> to vector<8x1xf32>
      %c0_6 = arith.constant 0 : index
      %c0_7 = arith.constant 0 : index
      %18 = vector.load %arg9[%c0_6, %c0_7] : memref<1x1xf32, #tpu.memory_space<vmem>>, vector<1x1xf32>
      %19 = vector.broadcast %18 : vector<1x1xf32> to vector<8x1xf32>
      %20 = arith.addf %17, %19 : vector<8x1xf32>
      %21 = arith.negf %20 : vector<8x1xf32>
      %22 = math.exp %21 : vector<8x1xf32>
      %cst_8 = arith.constant 1.000000e+00 : f32
      %23 = vector.broadcast %cst_8 : f32 to vector<8x1xf32>
      %24 = arith.addf %23, %22 : vector<8x1xf32>
      %25 = arith.divf %23, %24 : vector<8x1xf32>
      %c0_9 = arith.constant 0 : index
      %c0_10 = arith.constant 0 : index
      %26 = vector.load %arg10[%c0_9, %c0_10] : memref<8x1xf32, #tpu.memory_space<vmem>>, vector<8x1xf32>
      tpu.vector_store %arg10[%c0_9, %c0_10], %25 {strides = array<i32>} : memref<8x1xf32, #tpu.memory_space<vmem>>, vector<8x1xf32>,
    } else {
    }
    return
  }
  func.func @transform_0(%arg0: i32, %arg1: i32, %arg2: memref<2xi32, #tpu.memory_space<smem>>) -> (i32, i32, i32) {
    %0 = arith.index_cast %arg0 : i32 to index
    %1 = memref.load %arg2[%0] : memref<2xi32, #tpu.memory_space<smem>>
    %c1_i32 = arith.constant 1 : i32
    %2 = arith.subi %1, %c1_i32 : i32
    %c0_i32 = arith.constant 0 : i32
    %3 = arith.maxsi %2, %c0_i32 : i32
    %4 = arith.minsi %arg1, %3 : i32
    %c0_i32_0 = arith.constant 0 : i32
    %c0_i32_1 = arith.constant 0 : i32
    return %4, %arg0, %c0_i32_0 : i32, i32, i32
  }
  func.func @transform_1(%arg0: i32, %arg1: i32, %arg2: memref<2xi32, #tpu.memory_space<smem>>) -> (i32, i32) {
    %c0_i32 = arith.constant 0 : i32
    %c0_i32_0 = arith.constant 0 : i32
    return %arg0, %c0_i32 : i32, i32
  }
  func.func @transform_2(%arg0: i32, %arg1: i32, %arg2: memref<2xi32, #tpu.memory_space<smem>>) -> (i32, i32) {
    %c0_i32 = arith.constant 0 : i32
    %c0_i32_0 = arith.constant 0 : i32
    return %arg0, %c0_i32 : i32, i32
  }
  func.func @transform_3(%arg0: i32, %arg1: i32, %arg2: memref<2xi32, #tpu.memory_space<smem>>) -> (i32, i32) {
    %c0_i32 = arith.constant 0 : i32
    %c0_i32_0 = arith.constant 0 : i32
    return %arg0, %c0_i32 : i32, i32
  }
  func.func @transform_4(%arg0: i32, %arg1: i32, %arg2: memref<2xi32, #tpu.memory_space<smem>>) -> (i32, i32) {
    %c0_i32 = arith.constant 0 : i32
    %c0_i32_0 = arith.constant 0 : i32
    %c0_i32_1 = arith.constant 0 : i32
    return %c0_i32, %c0_i32_0 : i32, i32
  }
  func.func @transform_5(%arg0: i32, %arg1: i32, %arg2: memref<2xi32, #tpu.memory_space<smem>>) -> (i32, i32) {
    %c0_i32 = arith.constant 0 : i32
    %c0_i32_0 = arith.constant 0 : i32
    %c0_i32_1 = arith.constant 0 : i32
    return %c0_i32, %c0_i32_0 : i32, i32
  }
  func.func @transform_6(%arg0: i32, %arg1: i32, %arg2: memref<2xi32, #tpu.memory_space<smem>>) -> (i32, i32) {
    %c0_i32 = arith.constant 0 : i32
    %c0_i32_0 = arith.constant 0 : i32
    %c0_i32_1 = arith.constant 0 : i32
    return %c0_i32, %c0_i32_0 : i32, i32
  }
  func.func @transform_7(%arg0: i32, %arg1: i32, %arg2: memref<2xi32, #tpu.memory_space<smem>>) -> (i32, i32) {
    %c0_i32 = arith.constant 0 : i32
    %c0_i32_0 = arith.constant 0 : i32
    return %arg0, %c0_i32 : i32, i32
  }
}

</mosaic_0001>

<bundles_post_ra>
// kernel: tpu_custom_call.1
= control target key start
LH: loop header
LB: loop body
LE: loop exit
PB: predicated region body
PF: predicated region fallthrough
CT: control target
= control target key end

     0   :  { %s3307_s0 = inlined_call_operand.vmem [shape: s32[2], index: 0, kind: input, shape index: {}]   ;;  %s3308_s1 = inlined_call_operand.hbm [shape: bf16[16,16,512], index: 1, kind: input, shape index: {}]   ;;  %s3309_s2 = inlined_call_operand.vmem [shape: s32[16,1], index: 2, kind: input, shape index: {}]   ;;  %s3310_s3 = inlined_call_operand.vmem [shape: f32[16,128], index: 3, kind: input, shape index: {}]   ;;  %s3311_s4 = inlined_call_operand.hbm [shape: f32[16,128], index: 4, kind: input, shape index: {}]   ;;  %s3312_s5 = inlined_call_operand.hbm [shape: bf16[128,512], index: 5, kind: input, shape index: {}]   ;;  %s3313_s6 = inlined_call_operand.vmem [shape: f32[1,128], index: 6, kind: input, shape index: {}]   ;;  %s3314_s8 = inlined_call_operand.vmem [shape: f32[16,1], index: 8, kind: output, shape index: {}]   ;;  %s3315_s7 = inlined_call_operand.<no memory space> [shape: f32[1,1], index: 7, kind: input, shape index: {}]  }
   0x1   :  { %3329 = sst [smem:[#allocation24_spill]] %s3308_s1  ;;  %s13_s29 = sshll.u32 %s3307_s0, 4  ;;  %v17_v0 = vstv %s3315_s7  ;;  %s14_s29 = int_to_ptr.vmem [resolvable:$true] %s13_s29 }
   0x2   :  { %3330 = sst [smem:[#allocation25_spill]] %s3309_s2  ;;  %18 = vst [vmem:[#allocation6] sm:$0x1] %v17_v0  ;;  %s2269_s10 = scalar_lea.vmem %s14_s29, 16 }
   0x3   :  { %3331 = sst [smem:[#allocation26_spill]] %s3310_s3  ;;  %p2270_p0 = scmp.ne.s32.totalorder %s14_s29, %s2269_s10 }
   0x4   :  { %3332 = sst [smem:[#allocation27_spill]] %s3312_s5  ;;  %p2274_p1 = scmp.lt.s32.totalorder %s14_s29, %s14_s29 }
   0x5   :  { %3333 = sst [smem:[#allocation28_spill]] %s3313_s6  ;;  %p2275_p2 = scmp.lt.s32.totalorder %s2269_s10, %s2269_s10 }
   0x6   :  { %3334 = sst [smem:[#allocation29_spill]] %s3314_s8 }
   0x7   :  { %p2276_p3 = por %p2275_p2, %p2274_p1 }
   0x9   :  { %p2277_p4 = pnand %p2276_p3, %p2270_p0 }
   0xb   :  { %2280 = shalt.err (!%p2277_p4)  }
   0xc   :  { %s2465_s11 = smov [#allocation5]  }
   0xd   :  { %16 = dma.vmem_to_smem %s14_s29, 16, %s2465_s11, [#allocation4] }
   0xe   :  { %2407 = dma.done.wait [#allocation4], 16 }
   0xf   :  { %2408 = vsyncadd [#allocation4], 4294967280 }
  0x10   :  { %20 = sfence }
  0x11   :  { %21 = vsyncpa [#allocation8], 0 }
  0x12   :  { %23 = vsyncpa [#allocation8 + $0x1], 0 }
  0x13   :  { %24 = vsyncpa [#allocation10], 0 }
  0x14   :  { %26 = vsyncpa [#allocation10 + $0x1], 0  ;;  %s2524_s0 = smov 0   ;;  %s2526_s7 = smov 0  }
  0x15   :  { %s2528_s12 = smov 0   ;;  %s2530_s13 = smov 0  }
  0x16   :  { %s2532_s14 = smov 0   ;;  %s2534_s15 = smov 0  }
  0x17   :  { %s2536_s16 = smov 0   ;;  %s2538_s17 = smov 0  }
  0x18   :  { %s2540_s18 = smov 0   ;;  %s2542_s19 = smov 0  }
  0x19   :  { %s2544_s20 = smov 0  }
  0x1a LB: > { %3335 = sst [smem:[#allocation18_spill]] %s2447_s16  ;;  %s3316_s21 = sadd.s32 4294967295, %s2463_s20   ;;  %s2463_s20 = sphi %s2544_s20, %s32_s20   ;;  %s2459_s19 = sphi %s2542_s19, %s3385_s19   ;;  %s2455_s18 = sphi %s2540_s18, %s3384_s18   ;;  %s2451_s17 = sphi %s2538_s17, %s3383_s17   ;;  %s2447_s16 = sphi %s2536_s16, %s3375_s16   ;;  %s2443_s15 = sphi %s2534_s15, %s3382_s15   ;;  %s2439_s14 = sphi %s2532_s14, %s3381_s14   ;;  %s2435_s13 = sphi %s2530_s13, %s3380_s13   ;;  %s2431_s12 = sphi %s2528_s12, %s3379_s12   ;;  %s2427_s7 = sphi %s2526_s7, %s3378_s7   ;;  %s2423_s0 = sphi %s2524_s0, %s3377_s0  }
  0x1b   : > { %3336 = sst [smem:[#allocation19_spill]] %s2451_s17  ;;  %p78_p5 = scmp.ne.s32.totalorder %s2439_s14, %s2435_s13 }
  0x1c   : > { %3337 = sst [smem:[#allocation20_spill]] %s2455_s18  ;;  %p2581_p6 = scmp.eq.s32.totalorder %s3316_s21, 0 }
  0x1d   : > { %p1837_p7 = scmp.ge.s32.totalorder %s2463_s20, 1  ;;  %p256_p8 = scmp.lt.s32.totalorder %s2463_s20, 5 }
  0x1e   : > { %s3338_s22 = scalar_select %p2581_p6, 1, 0 }
  0x1f   : > { %p2589_p9 = por %p2581_p6, %p78_p5  ;;  %p2593_p10 = pnand %p1837_p7, %p256_p8 }
  0x20   : > { %3339 = sst [smem:[#allocation21_spill]] %s3338_s22  ;;  %s2466_s25 = smov [#allocation11]  }
  0x21   : > { %s3340_s23 = scalar_select %p2589_p9, 1, 0 }
  0x22   : > { %s268_s26 = sshll.u32 %s2466_s25, 4  ;;  %p1945_p11 = pneg %p2593_p10  ;;  %s269_s26 = int_to_ptr.vmem [resolvable:$true] %s268_s26 }
  0x23   : > { %3341 = sst [smem:[#allocation22_spill]] %s3340_s23  ;;  %s2292_s27 = scalar_lea.vmem %s269_s26, 4096 }
  0x24   : > { %p1946_p12 = pnand %p1945_p11, %p2581_p6  ;;  %p2293_p0 = scmp.ne.s32.totalorder %s269_s26, %s2292_s27 }
  0x25   : > { %p2300_p3 = scmp.lt.s32.totalorder %s269_s26, %s269_s26  ;;  %p2301_p4 = scmp.lt.s32.totalorder %s2292_s27, %s2292_s27 }
  0x26   : > { %p2283_p13 = pneg %p1946_p12 }
  0x27   : > { %p2302_p5 = por %p2301_p4, %p2300_p3 }
  0x28   : > { %p2295_p1 = pnand %p2293_p0, %p2283_p13 }
  0x2a   : > { %p2296_p2 = pneg %p2295_p1 }
  0x2c   : > { %p2303_p7 = pnand %p2302_p5, %p2296_p2 }
  0x2e   : > { %2306 = shalt.err (!%p2303_p7)
}
  0x2f   : > { %s3317_s28 = smov 256   ;;  %s3318_s29 = smov 16  }
  0x30   : > { %s3343_s5 = sld [smem:[#allocation27_spill]]  ;;  %s41_s10 = sadd.s32 1, %s2455_s18 }
  0x31   : > { %p2608_p8 = scmp.ge.s32.totalorder %s41_s10, 2  ;;  %s48_s13 = sld [smem:[#allocation5 + %s2459_s19]] }
  0x32   : > { %p72_p11 = scmp.ne.s32.totalorder %s2443_s15, %s2439_s14  ;;  %p73_p13 = scmp.eq.s32.totalorder %s2463_s20, 0 }
  0x33   : > { %s3387_s10 = smov (%p2608_p8, %s41_s10), 0  ;;  %p3326_p0 = scmp.lt.s32.totalorder %s2463_s20, 4 }
  0x34   : > { %s3351_s1 = sld [smem:[#allocation24_spill]]  ;;  %s3352_s17 = sand.u32 1, %s2443_s15  }
  0x35   : > { %s289_s23 = scalar_lea.sflag [#allocation8], %s3352_s17 }
  0x36   : > { %1948 = dma.hbm_to_vmem [thread:$0]  (!%p1946_p12), %s3343_s5, 4096, %s269_s26, [#allocation10], %s3317_s28, %s3317_s28, %s3318_s29  }
  0x37   : > { %s3319_s26 = sand.u32 1, %s2443_s15   ;;  %p2626_p12 = por %p73_p13, %p72_p11 }
  0x38   : > { %s1835_s9 = sadd.s32 4294967295, %s48_s13  ;;  %s1840_s21 = sshll.u32 %s3319_s26, 7 }
  0x39   : > { %p50_p1 = scmp.gt.s32.totalorder %s1835_s9, 0  ;;  %s292_s29 = scalar_lea.vmem [#allocation7], %s1840_s21 }
  0x3a   : > { %s1937_s25 = scalar_select %p2626_p12, [#allocation5], [#allocation12] }
  0x3b   : > { %s3389_s9 = smov (!%p50_p1, %s1835_s9), 0  ;;  %s308_s27 = sshll.u32 %s292_s29, 4  ;;  %s2642_s27 = int_to_ptr.vmem [resolvable:$true] %s308_s27 }
  0x3c   : > { %s1938_s28 = scalar_select %p2626_p12, %s2459_s19, 0 }
  0x3d   : > { %p52_p2 = scmp.lt.s32.totalorder %s2455_s18, %s3389_s9  ;;  %s3391_s25 = smov (!%p3326_p0, %s1937_s25), [#allocation13] }
  0x3e   : > { %s3393_s28 = smov (!%p3326_p0, %s1938_s28), 0  ;;  %p2648_p3 = pnand %p3326_p0, %p2626_p12 }
  0x3f   : > { %s293_s26 = sld [smem:[%s3391_s25 + %s3393_s28]]  ;;  %s44_s21 = sadd.s32 1, %s2459_s19 }
  0x40   : > { %s3395_s21 = smov (!%p2608_p8, %s44_s21), %s2459_s19  ;;  %p150_p8 = scmp.ne.s32.totalorder %s2431_s12, %s2427_s7 }
  0x41   : > { %p46_p5 = scmp.ge.s32.totalorder %s3395_s21, 2  ;;  %p156_p1 = scmp.ne.s32.totalorder %s2427_s7, %s2423_s0 }
  0x42   : > { %s2660_s30 = scalar_select %p52_p2, %s2455_s18, %s3389_s9 }
  0x43   : > { %s3399_s21 = smov (%p46_p5, %s3395_s21), 0  ;;  %p2678_p12 = por %p150_p8, %p73_p13 }
  0x44   : > { %3347 = sst [smem:[#allocation23_spill]] %s3399_s21  ;;  %s2672_s11 = ssub.s32 %s2459_s19, %s3399_s21 }
  0x45   : > { %s1841_s29 = sadd.s32 4294967295, %s293_s26  ;;  %s2668_s28 = sld [smem:[#allocation5 + %s3399_s21]] }
  0x46   : > { %p295_p4 = scmp.gt.s32.totalorder %s1841_s29, 0  ;;  %s3349_s5 = sshll.u32 %s2459_s19, 2 }
  0x47   : > { %p2689_p2 = por %p156_p1, %p2581_p6  ;;  %p2309_p13 = pneg %p2648_p3 }
  0x48   : > { %s3397_s29 = smov (!%p295_p4, %s1841_s29), 0  ;;  %s2320_s0 = scalar_lea.vmem %s2642_s27, 2048 }
  0x49   : > { %p297_p7 = scmp.lt.s32.totalorder %s2455_s18, %s3397_s29  ;;  %p2321_p4 = scmp.ne.s32.totalorder %s2642_s27, %s2320_s0 }
  0x4b   : > { %s298_s25 = scalar_select %p297_p7, %s2455_s18, %s3397_s29 }
  0x4c   : > { %s1836_s16 = sadd.s32 4294967295, %s2668_s28  ;;  %p2323_p5 = pnand %p2321_p4, %p2309_p13 }
  0x4d   : > { %s1934_s9 = sshll.u32 %s298_s25, 6 }
  0x4e   : > { %s305_s6 = sadd.s32 %s1934_s9, %s3349_s5  ;;  %p2324_p7 = pneg %p2323_p5 }
  0x4f   : > { %s1845_s3 = sshll.u32 %s305_s6, 6  ;;  %s2469_s5 = smov [#allocation7]  }
  0x50   : > { %s307_s18 = scalar_lea.hbm %s3351_s1, %s1845_s3  ;;  %s2325_s6 = sshll.u32 %s2469_s5, 4  ;;  %s2326_s6 = int_to_ptr.vmem [resolvable:$false] %s2325_s6 }
  0x51   : > { %s2327_s25 = scalar_lea.vmem %s2326_s6, 4096  ;;  %p2328_p8 = scmp.lt.s32.totalorder %s2642_s27, %s2326_s6 }
  0x52   : > { %p2329_p1 = scmp.lt.s32.totalorder %s2327_s25, %s2320_s0 }
  0x54   : > { %p2330_p0 = por %p2329_p1, %p2328_p8 }
  0x56   : > { %p2331_p11 = pnand %p2330_p0, %p2324_p7 }
  0x58   : > { %2334 = shalt.err (!%p2331_p11)
}
  0x59   : > { %s2470_s21 = smov 512   ;;  %s3353_s3 = smov 16  }
  0x5a   : > { %s3354_s17 = smov 256   ;;  %p56_p0 = scmp.gt.s32.totalorder %s1836_s16, 0 }
  0x5b   : > { %1954 = dma.hbm_to_vmem [thread:$0]  (!%p2648_p3), %s307_s18, 2048, %s2642_s27, %s289_s23, %s2470_s21, %s3354_s17, %s3353_s3  }
  0x5c   : > { %s3355_s28 = sadd.s32 1, %s2431_s12  ;;  %p3356_p11 = scmp.eq.s32.totalorder %s2672_s11, 0 }
  0x5d   : > { %s3401_s16 = smov (!%p56_p0, %s1836_s16), 0  ;;  %s334_s9 = sand.u32 1, %s2431_s12  }
  0x5e   : > { %s2714_s13 = scalar_select %p3356_p11, %s2431_s12, %s3355_s28  }
  0x5f   : > { %s1847_s29 = sshll.u32 %s2459_s19, 7  ;;  %p58_p13 = scmp.lt.s32.totalorder %s3387_s10, %s3401_s16 }
  0x60   : > { %s1846_s0 = sshll.u32 %s334_s9, 3  ;;  %s341_s25 = scalar_lea.hbm %s3311_s4, %s1847_s29 }
  0x61   : > { %s59_s8 = scalar_select %p58_p13, %s3387_s10, %s3401_s16 }
  0x62   : > { %s336_s1 = scalar_lea.vmem [#allocation9], %s1846_s0  ;;  %p3357_p3 = scmp.lt.s32.totalorder %s2463_s20, 4 }
  0x63   : > { %s343_s22 = sshll.u32 %s336_s1, 4  ;;  %s60_s23 = ssub.s32 %s2660_s30, %s59_s8  ;;  %s344_s22 = int_to_ptr.vmem [resolvable:$true] %s343_s22 }
  0x64   : > { %p2727_p4 = pnand %p3357_p3, %p2678_p12  ;;  %s62_s27 = sor.u32 %s2672_s11, %s60_s23 }
  0x65   : > { %p63_p5 = scmp.eq.s32.totalorder %s62_s27, 0  ;;  %s3359_s21 = sand.u32 1, %s2463_s20  }
  0x66   : > { %s333_s3 = scalar_lea.sflag [#allocation10], %s3359_s21  ;;  %p2337_p7 = pneg %p2727_p4 }
  0x67   : > { %s2348_s17 = scalar_lea.vmem %s344_s22, 128  ;;  %s2471_s1 = smov [#allocation9]  }
  0x68   : > { %p2349_p8 = scmp.ne.s32.totalorder %s344_s22, %s2348_s17  ;;  %s2353_s16 = sshll.u32 %s2471_s1, 4  ;;  %s2354_s16 = int_to_ptr.vmem [resolvable:$false] %s2353_s16 }
  0x69   : > { %s2355_s26 = scalar_lea.vmem %s2354_s16, 256  ;;  %p2356_p12 = scmp.lt.s32.totalorder %s344_s22, %s2354_s16 }
  0x6a   : > { %p2351_p1 = pnand %p2349_p8, %p2337_p7  ;;  %p2357_p11 = scmp.lt.s32.totalorder %s2355_s26, %s2348_s17 }
  0x6c   : > { %p2352_p0 = pneg %p2351_p1  ;;  %p2358_p13 = por %p2357_p11, %p2356_p12 }
  0x6e   : > { %p2359_p3 = pnand %p2358_p13, %p2352_p0 }
  0x70   : > { %2362 = shalt.err (!%p2359_p3)
}
  0x71   : > { %1957 = dma.hbm_to_vmem [thread:$0]  (!%p2727_p4), %s341_s25, 128, %s344_s22, %s333_s3  }
  0x72   : > { %s3360_s8 = sadd.s32 1, %s2443_s15  ;;  %352 = sbr.rel (%p2593_p10) target bundleno = 2401 (0x961), region = 48 }
  0x73   : > { %s2743_s30 = scalar_select %p63_p5, %s2443_s15, %s3360_s8  }
  0x74   : > { %s354_s28 = sand.u32 (!%p2593_p10), 1, %s2439_s14  }
  0x75   : > { %s1849_s9 = sshll.u32 (!%p2593_p10), %s354_s28, 7  ;;  %s355_s29 = scalar_lea.sflag (!%p2593_p10), [#allocation8], %s354_s28 }
  0x76   : > { %s2748_s0 = scalar_lea.vmem (!%p2593_p10), [#allocation7], %s1849_s9 }
  0x77   : > { %2410 = dma.done.wait (%p2589_p9), %s355_s29, 2048  }
  0x78   : > { %2412 = vsyncadd (%p2589_p9), %s355_s29, 4294965248  ;;  %s3362_s22 = sadd.s32 4294967295, %s2463_s20   ;;  %s365_s6 = sand.u32 1, %s2427_s7  }
  0x79   : > { %s363_s5 = sand.u32 1, %s3362_s22   ;;  %s1850_s24 = sshll.u32 %s365_s6, 3 }
  0x7a   : > { %s364_s25 = scalar_lea.sflag [#allocation10], %s363_s5  ;;  %s367_s18 = scalar_lea.vmem [#allocation9], %s1850_s24 }
  0x7b   : > { %2414 = dma.done.wait (%p2689_p2), %s364_s25, 128  }
  0x7c   : > { %2416 = vsyncadd (%p2689_p2), %s364_s25, 4294967168 }
  0x7d   : > { %2418 = dma.done.wait (%p2581_p6), [#allocation10], 4096  }
  0x7e   : > { %2420 = vsyncadd (%p2581_p6), [#allocation10], 4294963200  ;;  %s3364_s27 = sld [smem:[#allocation19_spill]] }
  0x7f   : > { %s3365_s21 = sld [smem:[#allocation18_spill]] }
  0x80   : > { %s3366_s2 = sld [smem:[#allocation25_spill]] }
  0x81   : > { %s3367_s28 = sld [smem:[#allocation26_spill]] }
  0x82   : > { %s3368_s5 = sld [smem:[#allocation29_spill]] }
  0x84   : > { %p421_p9 = scmp.lt.s32.totalorder %s3364_s27, 1 }
  0x85   : > { %s2767_s3 = sshll.u32 %s3365_s21, 3  ;;  %p1856_p6 = scmp.ne.s32.totalorder %s3365_s21, 0 }
  0x86   : > { %s3403_s27 = smov (!%p421_p9, %s3364_s27), 1 }
  0x87   : > { %s2770_s17 = sshll.u32 %s3403_s27, 3  ;;  %438 = sbr.rel (%p1856_p6) target bundleno = 143 (0x8f), region = 64 }
  0x88   : > { %s424_s26 = scalar_lea.vmem %s3366_s2, %s2770_s17  ;;  %s428_s9 = scalar_lea.vmem %s3367_s28, %s2770_s17 }
  0x89   : > { %s432_s6 = scalar_lea.vmem %s3368_s5, %s2770_s17 }
  0x8c   : > { %v439_v1 = vld [vmem:[%s428_s9] sm:$0xff] }
  0x8d   : > { %v441_v2 = vld [vmem:[%s367_s18] sm:$0xff]  ;;  %440 = vst [vmem:[#allocation2] sm:$0xff] %v439_v1 }
  0x8e   : > { %442 = vst [vmem:[#allocation3] sm:$0xff] %v441_v2 }
  0x8f PF: > { %s3369_s24 = sld [smem:[#allocation19_spill]] }
  0x90   : > { %s3370_s23 = sld [smem:[#allocation18_spill]] }
  0x95   : > { %s443_s25 = sld [smem:[#allocation5 + %s3369_s24]] }
  0x9b   : > { %p1857_p10 = scmp.ge.s32.totalorder %s3370_s23, %s443_s25 }
  0x9c   : > { %s887_s18 = sadd.s32 (!%p1857_p10), 1, %s2767_s3  ;;  %s1271_s16 = sadd.s32 (!%p1857_p10), 4, %s2767_s3 }
  0x9d   : > { %447 = sbr.rel (%p1857_p10) target bundleno = 2211 (0x8a3), region = 68  ;;  %s1527_s2 = sadd.s32 (!%p1857_p10), 6, %s2767_s3 }
  0x9e   : > { %s1143_s8 = sadd.s32 (!%p1857_p10), 3, %s2767_s3  ;;  %s1399_s11 = sadd.s32 (!%p1857_p10), 5, %s2767_s3 }
  0x9f   : > { %s1655_s28 = sadd.s32 (!%p1857_p10), 7, %s2767_s3 }
  0xa2   : > { %v2787_v3 = vld [vmem:[#allocation11 + $0xe4] ss:$16 sps:$4 sm:$0xff]   ;;  %v2789_v4 = vld [vmem:[#allocation11 + $0xe0] ss:$16 sps:$4 sm:$0xff]   ;;  %v2472_v5 = vmov 0   ;;  %v760_v26 = vstv %s2767_s3  ;;  %v888_v28 = vstv %s887_s18  ;;  %v1272_v35 = vstv %s1271_s16  ;;  %v484_v56 = vld [vmem:[%s2748_s0 + $0x8] sm:$0xff] }
  0xa3   : > { %682 = vmatprep.mubr.bf16.mxu0 %v2472_v5  ;;  %723 = vmatprep.mubr.bf16.mxu1 %v2472_v5  ;;  %v2794_v6 = vld [vmem:[#allocation11 + $0xc4] ss:$16 sps:$4 sm:$0xff]   ;;  %v2798_v7 = vld [vmem:[#allocation11 + $0xc0] ss:$16 sps:$4 sm:$0xff]   ;;  %v2804_v9 = vld [vmem:[#allocation11 + $0xec] ss:$16 sps:$4 sm:$0xff]   ;;  %v1528_v41 = vstv %s1527_s2  ;;  %v487_v60 = vunpack.c.l.bf16 %v484_v56  ;;  %v488_v1 = vunpack.c.h.bf16 %v484_v56 }
  0xa4   : > { %650 = vmatprep.subr.bf16.mxu0 %v2787_v3  ;;  %2055 = vset.pattern.permute.xlu0 %v2472_v5  ;;  %v2802_v8 = vld [vmem:[#allocation11 + $0xa4] ss:$16 sps:$4 sm:$0xff]   ;;  %v2806_v10 = vld [vmem:[#allocation11 + $0xe8] ss:$16 sps:$4 sm:$0xff]   ;;  %v2809_v11 = vld [vmem:[#allocation11 + $0xa0] ss:$16 sps:$4 sm:$0xff]  }
  0xa5   : > { %651 = vmatpush1.bf16.msra.mxu0 %v2789_v4  ;;  %2056 = vset.pattern.permute.xlu1 %v2472_v5  ;;  %v2813_v12 = vld [vmem:[#allocation11 + $0x84] ss:$16 sps:$4 sm:$0xff]   ;;  %v2816_v13 = vld [vmem:[#allocation11 + $0xcc] ss:$16 sps:$4 sm:$0xff]   ;;  %v2818_v14 = vld [vmem:[#allocation11 + $0xc8] ss:$16 sps:$4 sm:$0xff]  }
  0xa6   : > { %652 = vmatprep.subr.bf16.mxu0 %v2794_v6  ;;  %691 = vmatprep.subr.bf16.mxu1 %v2804_v9  ;;  %v2822_v15 = vld [vmem:[#allocation11 + $0x80] ss:$16 sps:$4 sm:$0xff]   ;;  %v2824_v16 = vld [vmem:[#allocation11 + $0x64] ss:$16 sps:$4 sm:$0xff]   ;;  %v2826_v17 = vld [vmem:[#allocation11 + $0xac] ss:$16 sps:$4 sm:$0xff]  }
  0xa7   : > { %692 = vmatpush1.bf16.msra.mxu1 %v2806_v10  ;;  %v2830_v18 = vld [vmem:[#allocation11 + $0xa8] ss:$16 sps:$4 sm:$0xff]   ;;  %v2833_v19 = vld [vmem:[#allocation11 + $0x8c] ss:$16 sps:$4 sm:$0xff]   ;;  %v2836_v20 = vld [vmem:[#allocation11 + $0x60] ss:$16 sps:$4 sm:$0xff]  }
  0xa8   : > { %693 = vmatprep.subr.bf16.mxu1 %v2816_v13  ;;  %v2839_v21 = vld [vmem:[#allocation11 + $0x44] ss:$16 sps:$4 sm:$0xff]   ;;  %v2842_v22 = vld [vmem:[#allocation11 + $0x88] ss:$16 sps:$4 sm:$0xff]   ;;  %v2845_v23 = vld [vmem:[#allocation11 + $0x6c] ss:$16 sps:$4 sm:$0xff]  }
  0xa9   : > { %653 = vmatpush1.bf16.msra.mxu0 %v2798_v7  ;;  %v2848_v24 = vld [vmem:[#allocation11 + $0x40] ss:$16 sps:$4 sm:$0xff]   ;;  %v2851_v25 = vld [vmem:[#allocation11 + $0x24] ss:$16 sps:$4 sm:$0xff]   ;;  %v2856_v27 = vld [vmem:[#allocation11 + $0x68] ss:$16 sps:$4 sm:$0xff]  }
  0xaa   : > { %654 = vmatprep.subr.bf16.mxu0 %v2802_v8  ;;  %v2859_v29 = vld [vmem:[#allocation11 + $0x4c] ss:$16 sps:$4 sm:$0xff]   ;;  %v2871_v31 = vld [vmem:[#allocation11 + $0x20] ss:$16 sps:$4 sm:$0xff]   ;;  %v2876_v33 = vld [vmem:[#allocation11 + $0x4] ss:$16 sps:$4 sm:$0xff]  }
  0xab   : > { %694 = vmatpush1.bf16.msra.mxu1 %v2818_v14  ;;  %v2866_v30 = vld [vmem:[%s424_s26] sm:$0xff]  ;;  %v2879_v34 = vld [vmem:[#allocation11 + $0x48] ss:$16 sps:$4 sm:$0xff]   ;;  %v483_v47 = vld [vmem:[%s2748_s0] sm:$0xff]  ;;  %s1015_s26 = sadd.s32 2, %s2767_s3 }
  0xac   : > { %695 = vmatprep.subr.bf16.mxu1 %v2826_v17  ;;  %vm761_vm0 = vcmp.gt.s32.totalorder %v2866_v30, %v760_v26  ;;  %vm889_vm1 = vcmp.gt.s32.totalorder %v2866_v30, %v888_v28  ;;  %v2882_v36 = vld [vmem:[#allocation11 + $0x2c] ss:$16 sps:$4 sm:$0xff]   ;;  %v2887_v38 = vld [vmem:[#allocation11] ss:$16 sps:$4 sm:$0xff]   ;;  %vm1273_vm2 = vcmp.gt.s32.totalorder %v2866_v30, %v1272_v35  ;;  %v2894_v40 = vld [vmem:[#allocation11 + $0x28] ss:$16 sps:$4 sm:$0xff]   ;;  %vm1529_vm3 = vcmp.gt.s32.totalorder %v2866_v30, %v1528_v41 }
  0xad   : > { %655 = vmatpush1.bf16.msra.mxu0 %v2809_v11  ;;  %v762_v32 = vsel %vm761_vm0, 1, %v2472_v5  ;;  %v890_v37 = vsel %vm889_vm1, 1, %v2472_v5  ;;  %v2889_v39 = vld [vmem:[#allocation2] sm:$0xff]  ;;  %v1274_v44 = vsel %vm1273_vm2, 1, %v2472_v5  ;;  %v2905_v45 = vld [vmem:[#allocation11 + $0x8] ss:$16 sps:$4 sm:$0xff]   ;;  %v485_v48 = vunpack.c.l.bf16 %v483_v47 }
  0xae   : > { %656 = vmatprep.subr.bf16.mxu0 %v2813_v12  ;;  %764 = vperm.xlu0 %2055, %v762_v32   ;;  %v2897_v42 = vld [vmem:[#allocation11 + $0xc] ss:$16 sps:$4 sm:$0xff]   ;;  %v489_v43 = vpack.c.bf16 %v2889_v39, %v2889_v39  ;;  %v1530_v46 = vsel %vm1529_vm3, 1, %v2472_v5  ;;  %v486_v49 = vunpack.c.h.bf16 %v483_v47 }
  0xaf   : > { %696 = vmatpush1.bf16.msra.mxu1 %v2830_v18 }
  0xb0   : > { %697 = vmatprep.subr.bf16.mxu1 %v2833_v19 }
  0xb1   : > { %657 = vmatpush1.bf16.msra.mxu0 %v2822_v15 }
  0xb2   : > { %658 = vmatprep.subr.bf16.mxu0 %v2824_v16  ;;  %892 = vperm.xlu0 %2055, %v890_v37  }
  0xb3   : > { %698 = vmatpush1.bf16.msra.mxu1 %v2842_v22 }
  0xb4   : > { %699 = vmatprep.subr.bf16.mxu1 %v2845_v23 }
  0xb5   : > { %659 = vmatpush1.bf16.msra.mxu0 %v2836_v20 }
  0xb6   : > { %660 = vmatprep.subr.bf16.mxu0 %v2839_v21  ;;  %1276 = vperm.xlu0 %2055, %v1274_v44  }
  0xb7   : > { %700 = vmatpush1.bf16.msra.mxu1 %v2856_v27 }
  0xb8   : > { %701 = vmatprep.subr.bf16.mxu1 %v2859_v29 }
  0xb9   : > { %661 = vmatpush1.bf16.msra.mxu0 %v2848_v24 }
  0xba   : > { %662 = vmatprep.subr.bf16.mxu0 %v2851_v25  ;;  %1532 = vperm.xlu0 %2055, %v1530_v46   ;;  %v482_v46 = vld [vmem:[#allocation3] sm:$0xff] }
  0xbb   : > { %702 = vmatpush1.bf16.msra.mxu1 %v2879_v34 }
  0xbc   : > { %703 = vmatprep.subr.bf16.mxu1 %v2882_v36 }
  0xbd   : > { %663 = vmatpush1.bf16.msra.mxu0 %v2871_v31 }
  0xbe   : > { %664 = vmatprep.subr.bf16.mxu0 %v2876_v33 }
  0xbf   : > { %704 = vmatpush1.bf16.msra.mxu1 %v2894_v40 }
  0xc0   : > { %705 = vmatprep.subr.bf16.mxu1 %v2897_v42 }
  0xc1   : > { %665 = vmatpush1.bf16.msra.mxu0 %v2887_v38 }
  0xc2   : > { %777 = vmatprep.subr.bf16.mxu0 %v2787_v3 }
  0xc3   : > { %706 = vmatpush1.bf16.msra.mxu1 %v2905_v45 }
  0xc4   : > { %683 = vmatmul.mubr.bf16.vlgmr.msra.gmra.mxu0 %v489_v43  ;;  %818 = vmatprep.subr.bf16.mxu1 %v2804_v9 }
  0xc5   : > { %778 = vmatpush1.bf16.msra.mxu0 %v2789_v4  ;;  %809 = vmatprep.mubr.bf16.mxu0 %v2472_v5 }
  0xc6   : > { %779 = vmatprep.subr.bf16.mxu0 %v2794_v6  ;;  %724 = vmatmul.mubr.bf16.vlgmr.msra.gmra.mxu1 %v489_v43 }
  0xc7   : > { %819 = vmatpush1.bf16.msra.mxu1 %v2806_v10  ;;  %850 = vmatprep.mubr.bf16.mxu1 %v2472_v5 }
  0xc8   : > { %820 = vmatprep.subr.bf16.mxu1 %v2816_v13 }
  0xc9   : > { %780 = vmatpush1.bf16.msra.mxu0 %v2798_v7 }
  0xca   : > { %781 = vmatprep.subr.bf16.mxu0 %v2802_v8 }
  0xcb   : > { %821 = vmatpush1.bf16.msra.mxu1 %v2818_v14 }
  0xcc   : > { %822 = vmatprep.subr.bf16.mxu1 %v2826_v17 }
  0xcd   : > { %782 = vmatpush1.bf16.msra.mxu0 %v2809_v11 }
  0xce   : > { %783 = vmatprep.subr.bf16.mxu0 %v2813_v12 }
  0xcf   : > { %823 = vmatpush1.bf16.msra.mxu1 %v2830_v18 }
  0xd0   : > { %824 = vmatprep.subr.bf16.mxu1 %v2833_v19 }
  0xd1   : > { %784 = vmatpush1.bf16.msra.mxu0 %v2822_v15 }
  0xd2   : > { %785 = vmatprep.subr.bf16.mxu0 %v2824_v16 }
  0xd3   : > { %825 = vmatpush1.bf16.msra.mxu1 %v2842_v22 }
  0xd4   : > { %826 = vmatprep.subr.bf16.mxu1 %v2845_v23 }
  0xd5   : > { %786 = vmatpush1.bf16.msra.mxu0 %v2836_v20 }
  0xd6   : > { %787 = vmatprep.subr.bf16.mxu0 %v2839_v21 }
  0xd7   : > { %827 = vmatpush1.bf16.msra.mxu1 %v2856_v27 }
  0xd8   : > { %828 = vmatprep.subr.bf16.mxu1 %v2859_v29 }
  0xd9   : > { %788 = vmatpush1.bf16.msra.mxu0 %v2848_v24 }
  0xda   : > { %789 = vmatprep.subr.bf16.mxu0 %v2851_v25 }
  0xdb   : > { %829 = vmatpush1.bf16.msra.mxu1 %v2879_v34 }
  0xdc   : > { %830 = vmatprep.subr.bf16.mxu1 %v2882_v36 }
  0xdd   : > { %790 = vmatpush1.bf16.msra.mxu0 %v2871_v31 }
  0xde   : > { %791 = vmatprep.subr.bf16.mxu0 %v2876_v33 }
  0xdf   : > { %831 = vmatpush1.bf16.msra.mxu1 %v2894_v40 }
  0xe0   : > { %832 = vmatprep.subr.bf16.mxu1 %v2897_v42 }
  0xe1   : > { %792 = vmatpush1.bf16.msra.mxu0 %v2887_v38 }
  0xe2   : > { %905 = vmatprep.subr.bf16.mxu0 %v2787_v3 }
  0xe3   : > { %833 = vmatpush1.bf16.msra.mxu1 %v2905_v45 }
  0xe4   : > { %946 = vmatprep.subr.bf16.mxu1 %v2804_v9 }
 0x129   : > { %v765_v47 = vpop.permute.xlu0 %764 }
 0x12a   : > { %vm766_vm4 = vcmp.eq.s32.totalorder %v765_v47, 1 }
 0x184   : > { %v684_v50 = vpop.f32.mrf.mxu0 }
 0x185   : > { %v732_v51 = vadd.f32 %v684_v50, %v485_v48 }
 0x186   : > { %v686_v52 = vpop.f32.mrf.mxu0  ;;  %v725_v58 = vpop.f32.mrf.mxu1 }
 0x187   : > { %v1890_v53 = vmul.f32 -1.442695, %v732_v51  ;;  %v733_v54 = vadd.f32 %v686_v52, %v486_v49  ;;  %v734_v63 = vadd.f32 %v725_v58, %v487_v60 }
 0x188   : > { %v688_v55 = vpop.f32.mrf.mxu0  ;;  %v727_v61 = vpop.f32.mrf.mxu1 }
 0x189   : > { %2105 = vpow2.f32 %v1890_v53  ;;  %v1891_v57 = vmul.f32 -1.442695, %v733_v54  ;;  %v1892_v2 = vmul.f32 -1.442695, %v734_v63  ;;  %v735_v26 = vadd.f32 %v727_v61, %v488_v1 }
 0x18a   : > { %v689_v59 = vpop.f32.mrf.mxu0  ;;  %v729_v62 = vpop.f32.mrf.mxu1  ;;  %v1400_v61 = vstv %s1399_s11  ;;  %v1656_v63 = vstv %s1655_s28 }
 0x18b   : > { %2107 = vpow2.f32 %v1891_v57  ;;  %v1144_v59 = vstv %s1143_s8  ;;  %vm1401_vm7 = vcmp.gt.s32.totalorder %v2866_v30, %v1400_v61  ;;  %vm1657_vm8 = vcmp.gt.s32.totalorder %v2866_v30, %v1656_v63 }
 0x18c   : > { %v730_v0 = vpop.f32.mrf.mxu1  ;;  %2109 = vpow2.f32 %v1892_v2  ;;  %vm1145_vm6 = vcmp.gt.s32.totalorder %v2866_v30, %v1144_v59  ;;  %v1658_v1 = vsel %vm1657_vm8, 1, %v2472_v5  ;;  %v1893_v2 = vld [vmem:[%s2748_s0 + $0x10] sm:$0xff] }
 0x18d   : > { %2111 = vtanh.f32 %v735_v26  ;;  %v1146_v62 = vsel %vm1145_vm6, 1, %v2472_v5  ;;  %v1402_v0 = vsel %vm1401_vm7, 1, %v2472_v5  ;;  %v772_v26 = vunpack.c.l.bf16 %v1893_v2 }
 0x196   : > { %v2106_v28 = vpop.eup %2105 }
 0x197   : > { %v745_v32 = vadd.f32 1.0, %v2106_v28  ;;  %v773_v28 = vunpack.c.h.bf16 %v1893_v2 }
 0x198   : > { %v2108_v35 = vpop.eup %2107 }
 0x199   : > { %2113 = vrcp.f32 %v745_v32  ;;  %v746_v37 = vadd.f32 1.0, %v2108_v35  ;;  %v2110_v41 = vpop.eup %2109 }
 0x19a   : > { %v2112_v43 = vpop.eup %2111  ;;  %v747_v49 = vadd.f32 1.0, %v2110_v41 }
 0x19b   : > { %2115 = vrcp.f32 %v746_v37 }
 0x19c   : > { %2117 = vrcp.f32 %v747_v49  ;;  %v1894_v49 = vld [vmem:[%s2748_s0 + $0x18] sm:$0xff] }
 0x1a6   : > { %v2114_v44 = vpop.eup %2113 }
 0x1a7   : > { %v756_v51 = vmul.f32 %v2114_v44, %v2112_v43 }
 0x1a8   : > { %v2116_v48 = vpop.eup %2115 }
 0x1a9   : > { %v755_v50 = vmul.f32 %v2116_v48, %v482_v46  ;;  %v2118_v54 = vpop.eup %2117 }
 0x1ab   : > { %v757_v52 = vadd.f32 %v756_v51, %v755_v50 }
 0x1ad   : > { %2119 = vtanh.f32 %v757_v52  ;;  %v2948_v53 = vsel %vm766_vm4, %v757_v52, %v482_v46  ;;  %v774_v52 = vunpack.c.l.bf16 %v1894_v49 }
 0x1ba   : > { %v2120_v55 = vpop.eup %2119 }
 0x1bb   : > { %v759_v56 = vmul.f32 %v2120_v55, %v2118_v54  ;;  %v775_v55 = vunpack.c.h.bf16 %v1894_v49 }
 0x1bd   : > { %v2951_v57 = vsel %vm766_vm4, %v759_v56, %v2889_v39  ;;  %v1016_v39 = vstv %s1015_s26 }
 0x1be   : > { %v776_v58 = vpack.c.bf16 %v2951_v57, %v2951_v57  ;;  %vm1017_vm5 = vcmp.gt.s32.totalorder %v2866_v30, %v1016_v39 }
 0x1bf   : > { %v1018_v60 = vsel %vm1017_vm5, 1, %v2472_v5 }
 0x1c0   : > { %810 = vmatmul.mubr.bf16.vlgmr.msra.gmra.mxu0 %v776_v58  ;;  %851 = vmatmul.mubr.bf16.vlgmr.msra.gmra.mxu1 %v776_v58 }
 0x1c1   : > { %906 = vmatpush1.bf16.msra.mxu0 %v2789_v4  ;;  %947 = vmatpush1.bf16.msra.mxu1 %v2806_v10 }
 0x1c2   : > { %907 = vmatprep.subr.bf16.mxu0 %v2794_v6  ;;  %948 = vmatprep.subr.bf16.mxu1 %v2816_v13 }
 0x1c3   : > { %937 = vmatprep.mubr.bf16.mxu0 %v2472_v5  ;;  %978 = vmatprep.mubr.bf16.mxu1 %v2472_v5 }
 0x1c4   : > { %1020 = vperm.xlu1 %2056, %v1018_v60  }
 0x1c5   : > { %908 = vmatpush1.bf16.msra.mxu0 %v2798_v7  ;;  %949 = vmatpush1.bf16.msra.mxu1 %v2818_v14 }
 0x1c6   : > { %909 = vmatprep.subr.bf16.mxu0 %v2802_v8  ;;  %950 = vmatprep.subr.bf16.mxu1 %v2826_v17 }
 0x1c8   : > { %1148 = vperm.xlu1 %2056, %v1146_v62  }
 0x1c9   : > { %910 = vmatpush1.bf16.msra.mxu0 %v2809_v11  ;;  %951 = vmatpush1.bf16.msra.mxu1 %v2830_v18 }
 0x1ca   : > { %911 = vmatprep.subr.bf16.mxu0 %v2813_v12  ;;  %952 = vmatprep.subr.bf16.mxu1 %v2833_v19 }
 0x1cc   : > { %1404 = vperm.xlu1 %2056, %v1402_v0  }
 0x1cd   : > { %912 = vmatpush1.bf16.msra.mxu0 %v2822_v15  ;;  %953 = vmatpush1.bf16.msra.mxu1 %v2842_v22 }
 0x1ce   : > { %913 = vmatprep.subr.bf16.mxu0 %v2824_v16  ;;  %954 = vmatprep.subr.bf16.mxu1 %v2845_v23 }
 0x1d0   : > { %1660 = vperm.xlu1 %2056, %v1658_v1  }
 0x1d1   : > { %914 = vmatpush1.bf16.msra.mxu0 %v2836_v20  ;;  %955 = vmatpush1.bf16.msra.mxu1 %v2856_v27 }
 0x1d2   : > { %915 = vmatprep.subr.bf16.mxu0 %v2839_v21  ;;  %956 = vmatprep.subr.bf16.mxu1 %v2859_v29 }
 0x1d5   : > { %916 = vmatpush1.bf16.msra.mxu0 %v2848_v24  ;;  %957 = vmatpush1.bf16.msra.mxu1 %v2879_v34 }
 0x1d6   : > { %917 = vmatprep.subr.bf16.mxu0 %v2851_v25  ;;  %958 = vmatprep.subr.bf16.mxu1 %v2882_v36 }
 0x1d9   : > { %918 = vmatpush1.bf16.msra.mxu0 %v2871_v31  ;;  %959 = vmatpush1.bf16.msra.mxu1 %v2894_v40 }
 0x1da   : > { %919 = vmatprep.subr.bf16.mxu0 %v2876_v33  ;;  %960 = vmatprep.subr.bf16.mxu1 %v2897_v42 }
 0x1dd   : > { %920 = vmatpush1.bf16.msra.mxu0 %v2887_v38  ;;  %961 = vmatpush1.bf16.msra.mxu1 %v2905_v45 }
 0x1de   : > { %1033 = vmatprep.subr.bf16.mxu0 %v2787_v3  ;;  %1074 = vmatprep.subr.bf16.mxu1 %v2804_v9 }
 0x280   : > { %v811_v32 = vpop.f32.mrf.mxu0  ;;  %v852_v35 = vpop.f32.mrf.mxu1 }
 0x281   : > { %v859_v37 = vadd.f32 %v811_v32, %v772_v26  ;;  %v861_v54 = vadd.f32 %v852_v35, %v774_v52  ;;  %v893_v32 = vpop.permute.xlu0 %892 }
 0x282   : > { %v813_v41 = vpop.f32.mrf.mxu0  ;;  %v854_v43 = vpop.f32.mrf.mxu1  ;;  %vm894_vm9 = vcmp.eq.s32.totalorder %v893_v32, 1 }
 0x283   : > { %v1895_v44 = vmul.f32 -1.442695, %v859_v37  ;;  %v860_v46 = vadd.f32 %v813_v41, %v773_v28  ;;  %v1897_v56 = vmul.f32 -1.442695, %v861_v54  ;;  %v862_v39 = vadd.f32 %v854_v43, %v775_v55 }
 0x284   : > { %v815_v47 = vpop.f32.mrf.mxu0  ;;  %v856_v48 = vpop.f32.mrf.mxu1 }
 0x285   : > { %2121 = vpow2.f32 %v1895_v44  ;;  %v1896_v30 = vmul.f32 -1.442695, %v860_v46 }
 0x286   : > { %v816_v50 = vpop.f32.mrf.mxu0  ;;  %v857_v51 = vpop.f32.mrf.mxu1 }
 0x287   : > { %2123 = vpow2.f32 %v1896_v30 }
 0x288   : > { %2125 = vpow2.f32 %v1897_v56 }
 0x292   : > { %v2122_v58 = vpop.eup %2121 }
 0x293   : > { %v872_v59 = vadd.f32 1.0, %v2122_v58 }
 0x294   : > { %v2124_v60 = vpop.eup %2123 }
 0x295   : > { %2127 = vrcp.f32 %v872_v59  ;;  %v873_v61 = vadd.f32 1.0, %v2124_v60  ;;  %v2126_v62 = vpop.eup %2125 }
 0x296   : > { %2129 = vtanh.f32 %v862_v39  ;;  %v874_v2 = vadd.f32 1.0, %v2126_v62  ;;  %v1899_v39 = vld [vmem:[%s2748_s0 + $0x28] sm:$0xff] }
 0x297   : > { %2131 = vrcp.f32 %v873_v61  ;;  %v902_v62 = vunpack.c.l.bf16 %v1899_v39 }
 0x298   : > { %2133 = vrcp.f32 %v874_v2 }
 0x2a2   : > { %v2128_v63 = vpop.eup %2127 }
 0x2a3   : > { %v2130_v0 = vpop.eup %2129 }
 0x2a4   : > { %v2132_v1 = vpop.eup %2131  ;;  %v883_v28 = vmul.f32 %v2130_v0, %v2128_v63  ;;  %v903_v0 = vunpack.c.h.bf16 %v1899_v39 }
 0x2a5   : > { %v882_v26 = vmul.f32 %v2132_v1, %v2948_v53  ;;  %v2134_v41 = vpop.eup %2133 }
 0x2a7   : > { %v884_v35 = vadd.f32 %v883_v28, %v882_v26 }
 0x2a9   : > { %2135 = vtanh.f32 %v884_v35  ;;  %v3005_v37 = vsel %vm894_vm9, %v884_v35, %v2948_v53  ;;  %v1898_v53 = vld [vmem:[%s2748_s0 + $0x20] sm:$0xff] }
 0x2aa   : > { %v901_v48 = vunpack.c.h.bf16 %v1898_v53 }
 0x2b6   : > { %v2136_v43 = vpop.eup %2135 }
 0x2b7   : > { %v886_v44 = vmul.f32 %v2136_v43, %v2134_v41 }
 0x2b9   : > { %v3008_v46 = vsel %vm894_vm9, %v886_v44, %v2951_v57  ;;  %v900_v57 = vunpack.c.l.bf16 %v1898_v53 }
 0x2ba   : > { %v904_v47 = vpack.c.bf16 %v3008_v46, %v3008_v46 }
 0x2bc   : > { %938 = vmatmul.mubr.bf16.vlgmr.msra.gmra.mxu0 %v904_v47  ;;  %979 = vmatmul.mubr.bf16.vlgmr.msra.gmra.mxu1 %v904_v47  ;;  %v1021_v47 = vpop.permute.xlu1 %1020 }
 0x2bd   : > { %1034 = vmatpush1.bf16.msra.mxu0 %v2789_v4  ;;  %1075 = vmatpush1.bf16.msra.mxu1 %v2806_v10  ;;  %vm1022_vm10 = vcmp.eq.s32.totalorder %v1021_v47, 1 }
 0x2be   : > { %1035 = vmatprep.subr.bf16.mxu0 %v2794_v6  ;;  %1076 = vmatprep.subr.bf16.mxu1 %v2816_v13 }
 0x2bf   : > { %1065 = vmatprep.mubr.bf16.mxu0 %v2472_v5  ;;  %1106 = vmatprep.mubr.bf16.mxu1 %v2472_v5 }
 0x2c1   : > { %1036 = vmatpush1.bf16.msra.mxu0 %v2798_v7  ;;  %1077 = vmatpush1.bf16.msra.mxu1 %v2818_v14 }
 0x2c2   : > { %1037 = vmatprep.subr.bf16.mxu0 %v2802_v8  ;;  %1078 = vmatprep.subr.bf16.mxu1 %v2826_v17 }
 0x2c5   : > { %1038 = vmatpush1.bf16.msra.mxu0 %v2809_v11  ;;  %1079 = vmatpush1.bf16.msra.mxu1 %v2830_v18 }
 0x2c6   : > { %1039 = vmatprep.subr.bf16.mxu0 %v2813_v12  ;;  %1080 = vmatprep.subr.bf16.mxu1 %v2833_v19 }
 0x2c9   : > { %1040 = vmatpush1.bf16.msra.mxu0 %v2822_v15  ;;  %1081 = vmatpush1.bf16.msra.mxu1 %v2842_v22 }
 0x2ca   : > { %1041 = vmatprep.subr.bf16.mxu0 %v2824_v16  ;;  %1082 = vmatprep.subr.bf16.mxu1 %v2845_v23 }
 0x2cd   : > { %1042 = vmatpush1.bf16.msra.mxu0 %v2836_v20  ;;  %1083 = vmatpush1.bf16.msra.mxu1 %v2856_v27 }
 0x2ce   : > { %1043 = vmatprep.subr.bf16.mxu0 %v2839_v21  ;;  %1084 = vmatprep.subr.bf16.mxu1 %v2859_v29 }
 0x2d1   : > { %1044 = vmatpush1.bf16.msra.mxu0 %v2848_v24  ;;  %1085 = vmatpush1.bf16.msra.mxu1 %v2879_v34 }
 0x2d2   : > { %1045 = vmatprep.subr.bf16.mxu0 %v2851_v25  ;;  %1086 = vmatprep.subr.bf16.mxu1 %v2882_v36 }
 0x2d5   : > { %1046 = vmatpush1.bf16.msra.mxu0 %v2871_v31  ;;  %1087 = vmatpush1.bf16.msra.mxu1 %v2894_v40 }
 0x2d6   : > { %1047 = vmatprep.subr.bf16.mxu0 %v2876_v33  ;;  %1088 = vmatprep.subr.bf16.mxu1 %v2897_v42 }
 0x2d9   : > { %1048 = vmatpush1.bf16.msra.mxu0 %v2887_v38  ;;  %1089 = vmatpush1.bf16.msra.mxu1 %v2905_v45 }
 0x2da   : > { %1161 = vmatprep.subr.bf16.mxu0 %v2787_v3  ;;  %1202 = vmatprep.subr.bf16.mxu1 %v2804_v9 }
 0x37c   : > { %v939_v49 = vpop.f32.mrf.mxu0  ;;  %v980_v30 = vpop.f32.mrf.mxu1 }
 0x37d   : > { %v987_v50 = vadd.f32 %v939_v49, %v900_v57  ;;  %v989_v63 = vadd.f32 %v980_v30, %v902_v62 }
 0x37e   : > { %v941_v51 = vpop.f32.mrf.mxu0  ;;  %v982_v52 = vpop.f32.mrf.mxu1 }
 0x37f   : > { %v1900_v54 = vmul.f32 -1.442695, %v987_v50  ;;  %v988_v55 = vadd.f32 %v941_v51, %v901_v48  ;;  %v1902_v1 = vmul.f32 -1.442695, %v989_v63  ;;  %v990_v26 = vadd.f32 %v982_v52, %v903_v0 }
 0x380   : > { %v943_v56 = vpop.f32.mrf.mxu0  ;;  %v984_v58 = vpop.f32.mrf.mxu1 }
 0x381   : > { %2137 = vpow2.f32 %v1900_v54  ;;  %v1901_v59 = vmul.f32 -1.442695, %v988_v55 }
 0x382   : > { %v944_v60 = vpop.f32.mrf.mxu0  ;;  %v985_v61 = vpop.f32.mrf.mxu1 }
 0x383   : > { %2139 = vpow2.f32 %v1901_v59 }
 0x384   : > { %2141 = vpow2.f32 %v1902_v1 }
 0x38e   : > { %v2138_v2 = vpop.eup %2137 }
 0x38f   : > { %v1000_v28 = vadd.f32 1.0, %v2138_v2 }
 0x390   : > { %v2140_v32 = vpop.eup %2139 }
 0x391   : > { %2143 = vrcp.f32 %v1000_v28  ;;  %v1001_v35 = vadd.f32 1.0, %v2140_v32  ;;  %v2142_v41 = vpop.eup %2141 }
 0x392   : > { %2145 = vtanh.f32 %v990_v26  ;;  %v1002_v57 = vadd.f32 1.0, %v2142_v41  ;;  %v1904_v26 = vld [vmem:[%s2748_s0 + $0x38] sm:$0xff] }
 0x393   : > { %2147 = vrcp.f32 %v1001_v35 }
 0x394   : > { %2149 = vrcp.f32 %v1002_v57 }
 0x39e   : > { %v2144_v43 = vpop.eup %2143 }
 0x39f   : > { %v2146_v44 = vpop.eup %2145 }
 0x3a0   : > { %v2148_v53 = vpop.eup %2147  ;;  %v1011_v49 = vmul.f32 %v2146_v44, %v2144_v43  ;;  %v1031_v43 = vunpack.c.h.bf16 %v1904_v26 }
 0x3a1   : > { %v1010_v48 = vmul.f32 %v2148_v53, %v3005_v37  ;;  %v2150_v51 = vpop.eup %2149 }
 0x3a3   : > { %v1012_v30 = vadd.f32 %v1011_v49, %v1010_v48 }
 0x3a5   : > { %2151 = vtanh.f32 %v1012_v30  ;;  %v3050_v50 = vsel %vm1022_vm10, %v1012_v30, %v3005_v37  ;;  %v1903_v37 = vld [vmem:[%s2748_s0 + $0x30] sm:$0xff] }
 0x3a6   : > { %v1029_v58 = vunpack.c.h.bf16 %v1903_v37 }
 0x3b2   : > { %v2152_v52 = vpop.eup %2151 }
 0x3b3   : > { %v1014_v54 = vmul.f32 %v2152_v52, %v2150_v51 }
 0x3b5   : > { %v3053_v55 = vsel %vm1022_vm10, %v1014_v54, %v3008_v46  ;;  %v1028_v46 = vunpack.c.l.bf16 %v1903_v37 }
 0x3b6   : > { %v1032_v56 = vpack.c.bf16 %v3053_v55, %v3053_v55 }
 0x3b8   : > { %1066 = vmatmul.mubr.bf16.vlgmr.msra.gmra.mxu0 %v1032_v56  ;;  %1107 = vmatmul.mubr.bf16.vlgmr.msra.gmra.mxu1 %v1032_v56 }
 0x3b9   : > { %1162 = vmatpush1.bf16.msra.mxu0 %v2789_v4  ;;  %1203 = vmatpush1.bf16.msra.mxu1 %v2806_v10 }
 0x3ba   : > { %1163 = vmatprep.subr.bf16.mxu0 %v2794_v6  ;;  %1204 = vmatprep.subr.bf16.mxu1 %v2816_v13 }
 0x3bb   : > { %1193 = vmatprep.mubr.bf16.mxu0 %v2472_v5  ;;  %1234 = vmatprep.mubr.bf16.mxu1 %v2472_v5 }
 0x3bd   : > { %1164 = vmatpush1.bf16.msra.mxu0 %v2798_v7  ;;  %1205 = vmatpush1.bf16.msra.mxu1 %v2818_v14 }
 0x3be   : > { %1165 = vmatprep.subr.bf16.mxu0 %v2802_v8  ;;  %1206 = vmatprep.subr.bf16.mxu1 %v2826_v17 }
 0x3c1   : > { %1166 = vmatpush1.bf16.msra.mxu0 %v2809_v11  ;;  %1207 = vmatpush1.bf16.msra.mxu1 %v2830_v18 }
 0x3c2   : > { %1167 = vmatprep.subr.bf16.mxu0 %v2813_v12  ;;  %1208 = vmatprep.subr.bf16.mxu1 %v2833_v19 }
 0x3c5   : > { %1168 = vmatpush1.bf16.msra.mxu0 %v2822_v15  ;;  %1209 = vmatpush1.bf16.msra.mxu1 %v2842_v22 }
 0x3c6   : > { %1169 = vmatprep.subr.bf16.mxu0 %v2824_v16  ;;  %1210 = vmatprep.subr.bf16.mxu1 %v2845_v23 }
 0x3c9   : > { %1170 = vmatpush1.bf16.msra.mxu0 %v2836_v20  ;;  %1211 = vmatpush1.bf16.msra.mxu1 %v2856_v27 }
 0x3ca   : > { %1171 = vmatprep.subr.bf16.mxu0 %v2839_v21  ;;  %1212 = vmatprep.subr.bf16.mxu1 %v2859_v29 }
 0x3cd   : > { %1172 = vmatpush1.bf16.msra.mxu0 %v2848_v24  ;;  %1213 = vmatpush1.bf16.msra.mxu1 %v2879_v34 }
 0x3ce   : > { %1173 = vmatprep.subr.bf16.mxu0 %v2851_v25  ;;  %1214 = vmatprep.subr.bf16.mxu1 %v2882_v36 }
 0x3d1   : > { %1174 = vmatpush1.bf16.msra.mxu0 %v2871_v31  ;;  %1215 = vmatpush1.bf16.msra.mxu1 %v2894_v40 }
 0x3d2   : > { %1175 = vmatprep.subr.bf16.mxu0 %v2876_v33  ;;  %1216 = vmatprep.subr.bf16.mxu1 %v2897_v42 }
 0x3d5   : > { %1176 = vmatpush1.bf16.msra.mxu0 %v2887_v38  ;;  %1217 = vmatpush1.bf16.msra.mxu1 %v2905_v45 }
 0x3d6   : > { %1289 = vmatprep.subr.bf16.mxu0 %v2787_v3  ;;  %1330 = vmatprep.subr.bf16.mxu1 %v2804_v9  ;;  %v1030_v3 = vunpack.c.l.bf16 %v1904_v26 }
 0x478   : > { %v1067_v39 = vpop.f32.mrf.mxu0  ;;  %v1108_v59 = vpop.f32.mrf.mxu1 }
 0x479   : > { %v1115_v60 = vadd.f32 %v1067_v39, %v1028_v46  ;;  %v1117_v41 = vadd.f32 %v1108_v59, %v1030_v3 }
 0x47a   : > { %v1069_v61 = vpop.f32.mrf.mxu0  ;;  %v1110_v62 = vpop.f32.mrf.mxu1 }
 0x47b   : > { %v1905_v63 = vmul.f32 -1.442695, %v1115_v60  ;;  %v1116_v0 = vadd.f32 %v1069_v61, %v1029_v58  ;;  %v1907_v44 = vmul.f32 -1.442695, %v1117_v41  ;;  %v1118_v53 = vadd.f32 %v1110_v62, %v1031_v43  ;;  %v1149_v58 = vpop.permute.xlu1 %1148 }
 0x47c   : > { %v1071_v1 = vpop.f32.mrf.mxu0  ;;  %v1112_v2 = vpop.f32.mrf.mxu1  ;;  %vm1150_vm11 = vcmp.eq.s32.totalorder %v1149_v58, 1  ;;  %v3166_v58 = vld [vmem:[#allocation11 + $0xc8] ss:$16 sps:$4 sm:$0xff]  }
 0x47d   : > { %2153 = vpow2.f32 %v1905_v63  ;;  %v1906_v28 = vmul.f32 -1.442695, %v1116_v0 }
 0x47e   : > { %v1072_v32 = vpop.f32.mrf.mxu0  ;;  %v1113_v35 = vpop.f32.mrf.mxu1 }
 0x47f   : > { %2155 = vpow2.f32 %v1906_v28 }
 0x480   : > { %2157 = vpow2.f32 %v1907_v44  ;;  %v1277_v44 = vpop.permute.xlu0 %1276 }
 0x481   : > { %vm1278_vm12 = vcmp.eq.s32.totalorder %v1277_v44, 1 }
 0x48a   : > { %v2154_v47 = vpop.eup %2153 }
 0x48b   : > { %v1128_v57 = vadd.f32 1.0, %v2154_v47 }
 0x48c   : > { %v2156_v48 = vpop.eup %2155 }
 0x48d   : > { %2159 = vrcp.f32 %v1128_v57  ;;  %v1129_v49 = vadd.f32 1.0, %v2156_v48  ;;  %v2158_v30 = vpop.eup %2157 }
 0x48e   : > { %2161 = vtanh.f32 %v1118_v53  ;;  %v1130_v56 = vadd.f32 1.0, %v2158_v30 }
 0x48f   : > { %2163 = vrcp.f32 %v1129_v49 }
 0x490   : > { %2165 = vrcp.f32 %v1130_v56  ;;  %v3155_v56 = vld [vmem:[#allocation11 + $0xc4] ss:$16 sps:$4 sm:$0xff]  }
 0x49a   : > { %v2160_v51 = vpop.eup %2159 }
 0x49b   : > { %v2162_v52 = vpop.eup %2161 }
 0x49c   : > { %v2164_v54 = vpop.eup %2163  ;;  %v1139_v46 = vmul.f32 %v2162_v52, %v2160_v51  ;;  %v3149_v52 = vld [vmem:[#allocation11 + $0xe0] ss:$16 sps:$4 sm:$0xff]  }
 0x49d   : > { %v1138_v37 = vmul.f32 %v2164_v54, %v3050_v50  ;;  %v2166_v60 = vpop.eup %2165  ;;  %v3152_v54 = vld [vmem:[#allocation11 + $0xe8] ss:$16 sps:$4 sm:$0xff]  }
 0x49f   : > { %v1140_v39 = vadd.f32 %v1139_v46, %v1138_v37  ;;  %v3158_v37 = vld [vmem:[#allocation11 + $0xcc] ss:$16 sps:$4 sm:$0xff]   ;;  %v3163_v46 = vld [vmem:[#allocation11 + $0xc0] ss:$16 sps:$4 sm:$0xff]  }
 0x4a1   : > { %2167 = vtanh.f32 %v1140_v39  ;;  %v3095_v59 = vsel %vm1150_vm11, %v1140_v39, %v3050_v50  ;;  %v3169_v39 = vld [vmem:[#allocation11 + $0xa4] ss:$16 sps:$4 sm:$0xff]  }
 0x4ae   : > { %v2168_v61 = vpop.eup %2167 }
 0x4af   : > { %v1142_v62 = vmul.f32 %v2168_v61, %v2166_v60  ;;  %v3175_v60 = vld [vmem:[#allocation11 + $0xa0] ss:$16 sps:$4 sm:$0xff]   ;;  %v3178_v61 = vld [vmem:[#allocation11 + $0xa8] ss:$16 sps:$4 sm:$0xff]  }
 0x4b1   : > { %v3098_v63 = vsel %vm1150_vm11, %v1142_v62, %v3053_v55  ;;  %v3181_v62 = vld [vmem:[#allocation11 + $0x84] ss:$16 sps:$4 sm:$0xff]  }
 0x4b2   : > { %v1160_v0 = vpack.c.bf16 %v3098_v63, %v3098_v63 }
 0x4b4   : > { %1194 = vmatmul.mubr.bf16.vlgmr.msra.gmra.mxu0 %v1160_v0  ;;  %1235 = vmatmul.mubr.bf16.vlgmr.msra.gmra.mxu1 %v1160_v0  ;;  %v3187_v0 = vld [vmem:[#allocation11 + $0x80] ss:$16 sps:$4 sm:$0xff]  }
 0x4b5   : > { %1290 = vmatpush1.bf16.msra.mxu0 %v2789_v4  ;;  %1331 = vmatpush1.bf16.msra.mxu1 %v2806_v10  ;;  %v3134_v4 = vld [vmem:[#allocation11 + $0xe4] ss:$16 sps:$4 sm:$0xff]  }
 0x4b6   : > { %1291 = vmatprep.subr.bf16.mxu0 %v2794_v6  ;;  %1332 = vmatprep.subr.bf16.mxu1 %v2816_v13  ;;  %v1908_v6 = vld [vmem:[%s2748_s0 + $0x40] sm:$0xff] }
 0x4b7   : > { %1321 = vmatprep.mubr.bf16.mxu0 %v2472_v5  ;;  %1362 = vmatprep.mubr.bf16.mxu1 %v2472_v5 }
 0x4b9   : > { %1292 = vmatpush1.bf16.msra.mxu0 %v2798_v7  ;;  %1333 = vmatpush1.bf16.msra.mxu1 %v2818_v14  ;;  %v1156_v7 = vunpack.c.l.bf16 %v1908_v6 }
 0x4ba   : > { %1293 = vmatprep.subr.bf16.mxu0 %v2802_v8  ;;  %1334 = vmatprep.subr.bf16.mxu1 %v2826_v17  ;;  %v1157_v8 = vunpack.c.h.bf16 %v1908_v6  ;;  %v3190_v6 = vld [vmem:[#allocation11 + $0x88] ss:$16 sps:$4 sm:$0xff]  }
 0x4bd   : > { %1294 = vmatpush1.bf16.msra.mxu0 %v2809_v11  ;;  %1335 = vmatpush1.bf16.msra.mxu1 %v2830_v18 }
 0x4be   : > { %1295 = vmatprep.subr.bf16.mxu0 %v2813_v12  ;;  %1336 = vmatprep.subr.bf16.mxu1 %v2833_v19  ;;  %v1909_v19 = vld [vmem:[%s2748_s0 + $0x48] sm:$0xff] }
 0x4c1   : > { %1296 = vmatpush1.bf16.msra.mxu0 %v2822_v15  ;;  %1337 = vmatpush1.bf16.msra.mxu1 %v2842_v22 }
 0x4c2   : > { %1297 = vmatprep.subr.bf16.mxu0 %v2824_v16  ;;  %1338 = vmatprep.subr.bf16.mxu1 %v2845_v23  ;;  %v1158_v23 = vunpack.c.l.bf16 %v1909_v19 }
 0x4c5   : > { %1298 = vmatpush1.bf16.msra.mxu0 %v2836_v20  ;;  %1339 = vmatpush1.bf16.msra.mxu1 %v2856_v27 }
 0x4c6   : > { %1299 = vmatprep.subr.bf16.mxu0 %v2839_v21  ;;  %1340 = vmatprep.subr.bf16.mxu1 %v2859_v29 }
 0x4c9   : > { %1300 = vmatpush1.bf16.msra.mxu0 %v2848_v24  ;;  %1341 = vmatpush1.bf16.msra.mxu1 %v2879_v34  ;;  %v1159_v24 = vunpack.c.h.bf16 %v1909_v19 }
 0x4ca   : > { %1301 = vmatprep.subr.bf16.mxu0 %v2851_v25  ;;  %1342 = vmatprep.subr.bf16.mxu1 %v2882_v36 }
 0x4cd   : > { %1302 = vmatpush1.bf16.msra.mxu0 %v2871_v31  ;;  %1343 = vmatpush1.bf16.msra.mxu1 %v2894_v40 }
 0x4ce   : > { %1303 = vmatprep.subr.bf16.mxu0 %v2876_v33  ;;  %1344 = vmatprep.subr.bf16.mxu1 %v2897_v42 }
 0x4d1   : > { %1304 = vmatpush1.bf16.msra.mxu0 %v2887_v38  ;;  %1345 = vmatpush1.bf16.msra.mxu1 %v2905_v45 }
 0x4d2   : > { %1417 = vmatprep.subr.bf16.mxu0 %v3134_v4  ;;  %1458 = vmatprep.subr.bf16.mxu1 %v2804_v9 }
 0x574   : > { %v1195_v10 = vpop.f32.mrf.mxu0  ;;  %v1236_v11 = vpop.f32.mrf.mxu1 }
 0x575   : > { %v1243_v12 = vadd.f32 %v1195_v10, %v1156_v7  ;;  %v1245_v9 = vadd.f32 %v1236_v11, %v1158_v23  ;;  %v3193_v7 = vld [vmem:[#allocation11 + $0x64] ss:$16 sps:$4 sm:$0xff]   ;;  %v3199_v10 = vld [vmem:[#allocation11 + $0x60] ss:$16 sps:$4 sm:$0xff]   ;;  %v3202_v11 = vld [vmem:[#allocation11 + $0x68] ss:$16 sps:$4 sm:$0xff]  }
 0x576   : > { %v1197_v13 = vpop.f32.mrf.mxu0  ;;  %v1238_v14 = vpop.f32.mrf.mxu1 }
 0x577   : > { %v1910_v15 = vmul.f32 -1.442695, %v1243_v12  ;;  %v1244_v16 = vadd.f32 %v1197_v13, %v1157_v8  ;;  %v1912_v25 = vmul.f32 -1.442695, %v1245_v9  ;;  %v1246_v50 = vadd.f32 %v1238_v14, %v1159_v24  ;;  %v3196_v8 = vld [vmem:[#allocation11 + $0x6c] ss:$16 sps:$4 sm:$0xff]  }
 0x578   : > { %v1199_v17 = vpop.f32.mrf.mxu0  ;;  %v1240_v18 = vpop.f32.mrf.mxu1  ;;  %v3205_v12 = vld [vmem:[#allocation11 + $0x44] ss:$16 sps:$4 sm:$0xff]   ;;  %v3209_v13 = vld [vmem:[#allocation11 + $0x40] ss:$16 sps:$4 sm:$0xff]  }
 0x579   : > { %2169 = vpow2.f32 %v1910_v15  ;;  %v1911_v20 = vmul.f32 -1.442695, %v1244_v16  ;;  %v3213_v14 = vld [vmem:[#allocation11 + $0x24] ss:$16 sps:$4 sm:$0xff]  }
 0x57a   : > { %v1200_v21 = vpop.f32.mrf.mxu0  ;;  %v1241_v22 = vpop.f32.mrf.mxu1 }
 0x57b   : > { %2171 = vpow2.f32 %v1911_v20 }
 0x57c   : > { %2173 = vpow2.f32 %v1912_v25 }
 0x586   : > { %v2170_v27 = vpop.eup %2169 }
 0x587   : > { %v1256_v55 = vadd.f32 1.0, %v2170_v27 }
 0x588   : > { %v2172_v1 = vpop.eup %2171 }
 0x589   : > { %2175 = vrcp.f32 %v1256_v55  ;;  %v1257_v2 = vadd.f32 1.0, %v2172_v1  ;;  %v2174_v26 = vpop.eup %2173 }
 0x58a   : > { %2177 = vtanh.f32 %v1246_v50  ;;  %v1258_v3 = vadd.f32 1.0, %v2174_v26 }
 0x58b   : > { %2179 = vrcp.f32 %v1257_v2 }
 0x58c   : > { %2181 = vrcp.f32 %v1258_v3 }
 0x596   : > { %v2176_v28 = vpop.eup %2175 }
 0x597   : > { %v2178_v32 = vpop.eup %2177 }
 0x598   : > { %v2180_v35 = vpop.eup %2179  ;;  %v1267_v43 = vmul.f32 %v2178_v32, %v2176_v28 }
 0x599   : > { %v1266_v41 = vmul.f32 %v2180_v35, %v3095_v59  ;;  %v2182_v57 = vpop.eup %2181 }
 0x59b   : > { %v1268_v47 = vadd.f32 %v1267_v43, %v1266_v41  ;;  %v1405_v43 = vpop.permute.xlu1 %1404 }
 0x59c   : > { %vm1406_vm13 = vcmp.eq.s32.totalorder %v1405_v43, 1 }
 0x59d   : > { %2183 = vtanh.f32 %v1268_v47  ;;  %v3142_v53 = vsel %vm1278_vm12, %v1268_v47, %v3095_v59  ;;  %v3172_v59 = vld [vmem:[#allocation11 + $0xac] ss:$16 sps:$4 sm:$0xff]  }
 0x5aa   : > { %v2184_v48 = vpop.eup %2183 }
 0x5ab   : > { %v1270_v49 = vmul.f32 %v2184_v48, %v2182_v57 }
 0x5ad   : > { %v3145_v30 = vsel %vm1278_vm12, %v1270_v49, %v3098_v63  ;;  %v3184_v63 = vld [vmem:[#allocation11 + $0x8c] ss:$16 sps:$4 sm:$0xff]  }
 0x5ae   : > { %v1288_v51 = vpack.c.bf16 %v3145_v30, %v3145_v30 }
 0x5b0   : > { %1322 = vmatmul.mubr.bf16.vlgmr.msra.gmra.mxu0 %v1288_v51  ;;  %1363 = vmatmul.mubr.bf16.vlgmr.msra.gmra.mxu1 %v1288_v51 }
 0x5b1   : > { %1418 = vmatpush1.bf16.msra.mxu0 %v3149_v52  ;;  %1459 = vmatpush1.bf16.msra.mxu1 %v3152_v54 }
 0x5b2   : > { %1419 = vmatprep.subr.bf16.mxu0 %v3155_v56  ;;  %1460 = vmatprep.subr.bf16.mxu1 %v3158_v37 }
 0x5b3   : > { %1449 = vmatprep.mubr.bf16.mxu0 %v2472_v5  ;;  %1490 = vmatprep.mubr.bf16.mxu1 %v2472_v5 }
 0x5b5   : > { %1420 = vmatpush1.bf16.msra.mxu0 %v3163_v46  ;;  %1461 = vmatpush1.bf16.msra.mxu1 %v3166_v58 }
 0x5b6   : > { %1421 = vmatprep.subr.bf16.mxu0 %v3169_v39  ;;  %1462 = vmatprep.subr.bf16.mxu1 %v3172_v59 }
 0x5b9   : > { %1422 = vmatpush1.bf16.msra.mxu0 %v3175_v60  ;;  %1463 = vmatpush1.bf16.msra.mxu1 %v3178_v61 }
 0x5ba   : > { %1423 = vmatprep.subr.bf16.mxu0 %v3181_v62  ;;  %1464 = vmatprep.subr.bf16.mxu1 %v3184_v63 }
 0x5bd   : > { %1424 = vmatpush1.bf16.msra.mxu0 %v3187_v0  ;;  %1465 = vmatpush1.bf16.msra.mxu1 %v3190_v6 }
 0x5be   : > { %1425 = vmatprep.subr.bf16.mxu0 %v3193_v7  ;;  %1466 = vmatprep.subr.bf16.mxu1 %v3196_v8 }
 0x5c1   : > { %1426 = vmatpush1.bf16.msra.mxu0 %v3199_v10  ;;  %1467 = vmatpush1.bf16.msra.mxu1 %v3202_v11 }
 0x5c2   : > { %1427 = vmatprep.subr.bf16.mxu0 %v3205_v12  ;;  %1468 = vmatprep.subr.bf16.mxu1 %v2859_v29  ;;  %v2255_v29 = vld [vmem:[#allocation11 + $0xec] ss:$16 sps:$4 sm:$0xff]  }
 0x5c5   : > { %1428 = vmatpush1.bf16.msra.mxu0 %v3209_v13  ;;  %1469 = vmatpush1.bf16.msra.mxu1 %v2879_v34  ;;  %v1913_v34 = vld [vmem:[%s2748_s0 + $0x50] sm:$0xff] }
 0x5c6   : > { %1429 = vmatprep.subr.bf16.mxu0 %v3213_v14  ;;  %1470 = vmatprep.subr.bf16.mxu1 %v2882_v36  ;;  %v1284_v15 = vunpack.c.l.bf16 %v1913_v34  ;;  %v1285_v36 = vunpack.c.h.bf16 %v1913_v34 }
 0x5c9   : > { %1430 = vmatpush1.bf16.msra.mxu0 %v2871_v31  ;;  %1471 = vmatpush1.bf16.msra.mxu1 %v2894_v40 }
 0x5ca   : > { %1431 = vmatprep.subr.bf16.mxu0 %v2876_v33  ;;  %1472 = vmatprep.subr.bf16.mxu1 %v2897_v42 }
 0x5cd   : > { %1432 = vmatpush1.bf16.msra.mxu0 %v2887_v38  ;;  %1473 = vmatpush1.bf16.msra.mxu1 %v2905_v45  ;;  %v1914_v38 = vld [vmem:[%s2748_s0 + $0x58] sm:$0xff] }
 0x5ce   : > { %1545 = vmatprep.subr.bf16.mxu0 %v3134_v4  ;;  %1586 = vmatprep.subr.bf16.mxu1 %v2255_v29  ;;  %v1286_v22 = vunpack.c.l.bf16 %v1914_v38  ;;  %v1287_v9 = vunpack.c.h.bf16 %v1914_v38 }
 0x670   : > { %v1323_v16 = vpop.f32.mrf.mxu0  ;;  %v1364_v31 = vpop.f32.mrf.mxu1 }
 0x671   : > { %v1371_v17 = vadd.f32 %v1323_v16, %v1284_v15  ;;  %v1373_v23 = vadd.f32 %v1364_v31, %v1286_v22 }
 0x672   : > { %v1325_v40 = vpop.f32.mrf.mxu0  ;;  %v1366_v18 = vpop.f32.mrf.mxu1 }
 0x673   : > { %v1915_v33 = vmul.f32 -1.442695, %v1371_v17  ;;  %v1372_v19 = vadd.f32 %v1325_v40, %v1285_v36  ;;  %v1917_v24 = vmul.f32 -1.442695, %v1373_v23  ;;  %v1374_v27 = vadd.f32 %v1366_v18, %v1287_v9 }
 0x674   : > { %v1327_v42 = vpop.f32.mrf.mxu0  ;;  %v1368_v20 = vpop.f32.mrf.mxu1 }
 0x675   : > { %2185 = vpow2.f32 %v1915_v33  ;;  %v1916_v45 = vmul.f32 -1.442695, %v1372_v19 }
 0x676   : > { %v1328_v21 = vpop.f32.mrf.mxu0  ;;  %v1369_v4 = vpop.f32.mrf.mxu1 }
 0x677   : > { %2187 = vpow2.f32 %v1916_v45  ;;  %v1533_v4 = vpop.permute.xlu0 %1532 }
 0x678   : > { %2189 = vpow2.f32 %v1917_v24  ;;  %vm1534_vm14 = vcmp.eq.s32.totalorder %v1533_v4, 1 }
 0x682   : > { %v2186_v25 = vpop.eup %2185 }
 0x683   : > { %v1384_v50 = vadd.f32 1.0, %v2186_v25 }
 0x684   : > { %v2188_v55 = vpop.eup %2187 }
 0x685   : > { %2191 = vrcp.f32 %v1384_v50  ;;  %v1385_v1 = vadd.f32 1.0, %v2188_v55  ;;  %v2190_v2 = vpop.eup %2189 }
 0x686   : > { %2193 = vtanh.f32 %v1374_v27  ;;  %v1386_v35 = vadd.f32 1.0, %v2190_v2  ;;  %v1923_v2 = vld [vmem:[%s2748_s0 + $0x70] sm:$0xff] }
 0x687   : > { %2195 = vrcp.f32 %v1385_v1 }
 0x688   : > { %2197 = vrcp.f32 %v1386_v35 }
 0x692   : > { %v2192_v26 = vpop.eup %2191 }
 0x693   : > { %v2194_v28 = vpop.eup %2193 }
 0x694   : > { %v2196_v32 = vpop.eup %2195  ;;  %v1395_v41 = vmul.f32 %v2194_v28, %v2192_v26  ;;  %v1540_v26 = vunpack.c.l.bf16 %v1923_v2  ;;  %v1541_v28 = vunpack.c.h.bf16 %v1923_v2 }
 0x695   : > { %v1394_v3 = vmul.f32 %v2196_v32, %v3142_v53  ;;  %v2198_v57 = vpop.eup %2197 }
 0x697   : > { %v1396_v44 = vadd.f32 %v1395_v41, %v1394_v3 }
 0x699   : > { %2199 = vtanh.f32 %v1396_v44  ;;  %v3228_v47 = vsel %vm1406_vm13, %v1396_v44, %v3142_v53  ;;  %v2257_v53 = vld [vmem:[#allocation11 + $0x48] ss:$16 sps:$4 sm:$0xff]  }
 0x6a6   : > { %v2200_v48 = vpop.eup %2199 }
 0x6a7   : > { %v1398_v49 = vmul.f32 %v2200_v48, %v2198_v57 }
 0x6a9   : > { %v3231_v51 = vsel %vm1406_vm13, %v1398_v49, %v3145_v30  ;;  %v2258_v30 = vld [vmem:[#allocation11 + $0x2c] ss:$16 sps:$4 sm:$0xff]  }
 0x6aa   : > { %v1416_v29 = vpack.c.bf16 %v3231_v51, %v3231_v51  ;;  %v1924_v49 = vld [vmem:[%s2748_s0 + $0x78] sm:$0xff] }
 0x6ac   : > { %1450 = vmatmul.mubr.bf16.vlgmr.msra.gmra.mxu0 %v1416_v29  ;;  %1491 = vmatmul.mubr.bf16.vlgmr.msra.gmra.mxu1 %v1416_v29 }
 0x6ad   : > { %1546 = vmatpush1.bf16.msra.mxu0 %v3149_v52  ;;  %1587 = vmatpush1.bf16.msra.mxu1 %v3152_v54  ;;  %v2259_v52 = vld [vmem:[#allocation11 + $0x20] ss:$16 sps:$4 sm:$0xff]   ;;  %v2260_v54 = vld [vmem:[#allocation11 + $0x28] ss:$16 sps:$4 sm:$0xff]  }
 0x6ae   : > { %1547 = vmatprep.subr.bf16.mxu0 %v3155_v56  ;;  %1588 = vmatprep.subr.bf16.mxu1 %v3158_v37  ;;  %v2261_v56 = vld [vmem:[#allocation11 + $0x4] ss:$16 sps:$4 sm:$0xff]   ;;  %v2262_v37 = vld [vmem:[#allocation11 + $0xc] ss:$16 sps:$4 sm:$0xff]  }
 0x6af   : > { %1577 = vmatprep.mubr.bf16.mxu0 %v2472_v5  ;;  %1618 = vmatprep.mubr.bf16.mxu1 %v2472_v5  ;;  %v2256_v5 = vld [vmem:[#allocation11 + $0x4c] ss:$16 sps:$4 sm:$0xff]  }
 0x6b1   : > { %1548 = vmatpush1.bf16.msra.mxu0 %v3163_v46  ;;  %1589 = vmatpush1.bf16.msra.mxu1 %v3166_v58  ;;  %v2263_v46 = vld [vmem:[#allocation11] ss:$16 sps:$4 sm:$0xff]   ;;  %v2264_v58 = vld [vmem:[#allocation11 + $0x8] ss:$16 sps:$4 sm:$0xff]  }
 0x6b2   : > { %1549 = vmatprep.subr.bf16.mxu0 %v3169_v39  ;;  %1590 = vmatprep.subr.bf16.mxu1 %v3172_v59  ;;  %v1918_v39 = vld [vmem:[%s2748_s0 + $0x60] sm:$0xff] }
 0x6b3   : > { %v1412_v59 = vunpack.c.l.bf16 %v1918_v39 }
 0x6b5   : > { %1550 = vmatpush1.bf16.msra.mxu0 %v3175_v60  ;;  %1591 = vmatpush1.bf16.msra.mxu1 %v3178_v61  ;;  %v1413_v60 = vunpack.c.h.bf16 %v1918_v39 }
 0x6b6   : > { %1551 = vmatprep.subr.bf16.mxu0 %v3181_v62  ;;  %1592 = vmatprep.subr.bf16.mxu1 %v3184_v63 }
 0x6b9   : > { %1552 = vmatpush1.bf16.msra.mxu0 %v3187_v0  ;;  %1593 = vmatpush1.bf16.msra.mxu1 %v3190_v6 }
 0x6ba   : > { %1553 = vmatprep.subr.bf16.mxu0 %v3193_v7  ;;  %1594 = vmatprep.subr.bf16.mxu1 %v3196_v8 }
 0x6bd   : > { %1554 = vmatpush1.bf16.msra.mxu0 %v3199_v10  ;;  %1595 = vmatpush1.bf16.msra.mxu1 %v3202_v11 }
 0x6be   : > { %1555 = vmatprep.subr.bf16.mxu0 %v3205_v12  ;;  %1596 = vmatprep.subr.bf16.mxu1 %v2256_v5  ;;  %v1919_v12 = vld [vmem:[%s2748_s0 + $0x68] sm:$0xff] }
 0x6bf   : > { %v1414_v15 = vunpack.c.l.bf16 %v1919_v12  ;;  %v1415_v16 = vunpack.c.h.bf16 %v1919_v12 }
 0x6c1   : > { %1556 = vmatpush1.bf16.msra.mxu0 %v3209_v13  ;;  %1597 = vmatpush1.bf16.msra.mxu1 %v2257_v53  ;;  %v1542_v53 = vunpack.c.l.bf16 %v1924_v49 }
 0x6c2   : > { %1557 = vmatprep.subr.bf16.mxu0 %v3213_v14  ;;  %1598 = vmatprep.subr.bf16.mxu1 %v2258_v30 }
 0x6c5   : > { %1558 = vmatpush1.bf16.msra.mxu0 %v2259_v52  ;;  %1599 = vmatpush1.bf16.msra.mxu1 %v2260_v54  ;;  %v1543_v52 = vunpack.c.h.bf16 %v1924_v49 }
 0x6c6   : > { %1559 = vmatprep.subr.bf16.mxu0 %v2261_v56  ;;  %1600 = vmatprep.subr.bf16.mxu1 %v2262_v37 }
 0x6c9   : > { %1560 = vmatpush1.bf16.msra.mxu0 %v2263_v46  ;;  %1601 = vmatpush1.bf16.msra.mxu1 %v2264_v58 }
 0x76c   : > { %v1451_v61 = vpop.f32.mrf.mxu0  ;;  %v1492_v62 = vpop.f32.mrf.mxu1 }
 0x76d   : > { %v1499_v63 = vadd.f32 %v1451_v61, %v1412_v59  ;;  %v1501_v36 = vadd.f32 %v1492_v62, %v1414_v15 }
 0x76e   : > { %v1453_v0 = vpop.f32.mrf.mxu0  ;;  %v1494_v6 = vpop.f32.mrf.mxu1 }
 0x76f   : > { %v1920_v7 = vmul.f32 -1.442695, %v1499_v63  ;;  %v1500_v8 = vadd.f32 %v1453_v0, %v1413_v60  ;;  %v1922_v31 = vmul.f32 -1.442695, %v1501_v36  ;;  %v1502_v40 = vadd.f32 %v1494_v6, %v1415_v16  ;;  %v1661_v0 = vpop.permute.xlu1 %1660 }
 0x770   : > { %v1455_v10 = vpop.f32.mrf.mxu0  ;;  %v1496_v11 = vpop.f32.mrf.mxu1  ;;  %vm1662_vm15 = vcmp.eq.s32.totalorder %v1661_v0, 1 }
 0x771   : > { %2201 = vpow2.f32 %v1920_v7  ;;  %v1921_v13 = vmul.f32 -1.442695, %v1500_v8 }
 0x772   : > { %v1456_v14 = vpop.f32.mrf.mxu0  ;;  %v1497_v34 = vpop.f32.mrf.mxu1 }
 0x773   : > { %2203 = vpow2.f32 %v1921_v13 }
 0x774   : > { %2205 = vpow2.f32 %v1922_v31 }
 0x77e   : > { %v2202_v17 = vpop.eup %2201 }
 0x77f   : > { %v1512_v18 = vadd.f32 1.0, %v2202_v17 }
 0x780   : > { %v2204_v33 = vpop.eup %2203 }
 0x781   : > { %2207 = vrcp.f32 %v1512_v18  ;;  %v1513_v19 = vadd.f32 1.0, %v2204_v33  ;;  %v2206_v42 = vpop.eup %2205 }
 0x782   : > { %2209 = vtanh.f32 %v1502_v40  ;;  %v1514_v21 = vadd.f32 1.0, %v2206_v42 }
 0x783   : > { %2211 = vrcp.f32 %v1513_v19 }
 0x784   : > { %2213 = vrcp.f32 %v1514_v21 }
 0x78e   : > { %v2208_v20 = vpop.eup %2207 }
 0x78f   : > { %v2210_v38 = vpop.eup %2209 }
 0x790   : > { %v2212_v45 = vpop.eup %2211  ;;  %v1523_v23 = vmul.f32 %v2210_v38, %v2208_v20 }
 0x791   : > { %v1522_v22 = vmul.f32 %v2212_v45, %v3228_v47  ;;  %v2214_v25 = vpop.eup %2213 }
 0x793   : > { %v1524_v9 = vadd.f32 %v1523_v23, %v1522_v22 }
 0x795   : > { %2215 = vtanh.f32 %v1524_v9  ;;  %v1536_v24 = vsel %vm1534_vm14, %v1524_v9, %v3228_v47 }
 0x7a2   : > { %v2216_v27 = vpop.eup %2215 }
 0x7a3   : > { %v1526_v50 = vmul.f32 %v2216_v27, %v2214_v25 }
 0x7a5   : > { %v1535_v55 = vsel %vm1534_vm14, %v1526_v50, %v3231_v51 }
 0x7a6   : > { %v1544_v1 = vpack.c.bf16 %v1535_v55, %v1535_v55 }
 0x7a8   : > { %1578 = vmatmul.mubr.bf16.vlgmr.msra.gmra.mxu0 %v1544_v1  ;;  %1619 = vmatmul.mubr.bf16.vlgmr.msra.gmra.mxu1 %v1544_v1 }
 0x868   : > { %v1579_v32 = vpop.f32.mrf.mxu0  ;;  %v1620_v35 = vpop.f32.mrf.mxu1 }
 0x869   : > { %v1627_v3 = vadd.f32 %v1579_v32, %v1540_v26  ;;  %v1629_v30 = vadd.f32 %v1620_v35, %v1542_v53 }
 0x86a   : > { %v1581_v41 = vpop.f32.mrf.mxu0  ;;  %v1622_v43 = vpop.f32.mrf.mxu1 }
 0x86b   : > { %v1925_v44 = vmul.f32 -1.442695, %v1627_v3  ;;  %v1628_v57 = vadd.f32 %v1581_v41, %v1541_v28  ;;  %v1927_v54 = vmul.f32 -1.442695, %v1629_v30  ;;  %v1630_v37 = vadd.f32 %v1622_v43, %v1543_v52 }
 0x86c   : > { %v1583_v47 = vpop.f32.mrf.mxu0  ;;  %v1624_v48 = vpop.f32.mrf.mxu1 }
 0x86d   : > { %2217 = vpow2.f32 %v1925_v44  ;;  %v1926_v29 = vmul.f32 -1.442695, %v1628_v57 }
 0x86e   : > { %v1584_v51 = vpop.f32.mrf.mxu0  ;;  %v1625_v5 = vpop.f32.mrf.mxu1 }
 0x86f   : > { %2219 = vpow2.f32 %v1926_v29 }
 0x870   : > { %2221 = vpow2.f32 %v1927_v54 }
 0x87a   : > { %v2218_v56 = vpop.eup %2217 }
 0x87b   : > { %v1640_v46 = vadd.f32 1.0, %v2218_v56 }
 0x87c   : > { %v2220_v58 = vpop.eup %2219 }
 0x87d   : > { %2223 = vrcp.f32 %v1640_v46  ;;  %v1641_v39 = vadd.f32 1.0, %v2220_v58  ;;  %v2222_v59 = vpop.eup %2221 }
 0x87e   : > { %2225 = vtanh.f32 %v1630_v37  ;;  %v1642_v63 = vadd.f32 1.0, %v2222_v59 }
 0x87f   : > { %2227 = vrcp.f32 %v1641_v39 }
 0x880   : > { %2229 = vrcp.f32 %v1642_v63 }
 0x88a   : > { %v2224_v60 = vpop.eup %2223 }
 0x88b   : > { %v2226_v61 = vpop.eup %2225 }
 0x88c   : > { %v2228_v62 = vpop.eup %2227  ;;  %v1651_v7 = vmul.f32 %v2226_v61, %v2224_v60 }
 0x88d   : > { %v1650_v6 = vmul.f32 %v2228_v62, %v1536_v24  ;;  %v2230_v11 = vpop.eup %2229 }
 0x88f   : > { %v1652_v8 = vadd.f32 %v1651_v7, %v1650_v6 }
 0x891   : > { %2231 = vtanh.f32 %v1652_v8  ;;  %v1664_v10 = vsel %vm1662_vm15, %v1652_v8, %v1536_v24 }
 0x892   : > { %1666 = vst [vmem:[#allocation3] sm:$0xff] %v1664_v10 }
 0x89e   : > { %v2232_v12 = vpop.eup %2231 }
 0x89f   : > { %v1654_v13 = vmul.f32 %v2232_v12, %v2230_v11 }
 0x8a1   : > { %v1663_v14 = vsel %vm1662_vm15, %v1654_v13, %v1535_v55 }
 0x8a2   : > { %1665 = vst [vmem:[#allocation2] sm:$0xff] %v1663_v14 }
 0x8a3 PF: > { %s3372_s0 = sld [smem:[#allocation18_spill]] }
 0x8a9   : > { %p1928_p2 = scmp.ne.s32.totalorder %s3372_s0, 1 }
 0x8aa   : > { %s3373_s29 = sld [smem:[#allocation28_spill]] (!%p1928_p2) }
 0x8ab   : > { %1670 = sbr.rel (%p1928_p2) target bundleno = 2401 (0x961), region = 72 }
 0x8b0   : > { %v1671_v34 = vld [vmem:[#allocation2] sm:$0xff]  ;;  %v1930_v16 = vld [vmem:[#allocation6] ss:$0 sm:$0xff]  ;;  %vm1696_vm0 = vcmask 7168  }
 0x8b1   : > { %v1929_v15 = vld [vmem:[%s3373_s29] ss:$0 sm:$0xff] }
 0x8b2   : > { %v1679_v36 = vmul.f32 %v1929_v15, %v1671_v34 }
 0x8b4   : > { %1680 = vadd.xlane.f32.xlu0 %v1679_v36 }
 0x93d   : > { %v1681_v31 = vpop.xlane.xlu0 %1680 }
 0x93e   : > { %v1689_v17 = vadd.f32 %v1930_v16, %v1681_v31 }
 0x940   : > { %v1931_v40 = vmul.f32 -1.442695, %v1689_v17 }
 0x942   : > { %2265 = vpow2.f32 %v1931_v40 }
 0x94f   : > { %v2266_v18 = vpop.eup %2265 }
 0x950   : > { %v1693_v33 = vadd.f32 1.0, %v2266_v18 }
 0x952   : > { %2267 = vrcp.f32 %v1693_v33 }
 0x95f   : > { %v2268_v19 = vpop.eup %2267 }
 0x960   : > { %1697 = vst.msk [vmem:[%s432_s6] sm:$0xff] %vm1696_vm0, %v2268_v19 }
 0x961 PF: > { %s32_s20 = sadd.s32 1, %s2463_s20   ;;  %s3375_s16 = sld [smem:[#allocation20_spill]] }
 0x962   : > { %p29_p4 = scmp.ge.s32.totalorder %s32_s20, 6   ;;  %s3376_s25 = sld [smem:[#allocation23_spill]] }
 0x963   : > { %s3377_s0 = smov %s2427_s7  ;;  %s3378_s7 = smov %s2431_s12 }
 0x964   : > { %s3379_s12 = smov %s2714_s13  ;;  %s3380_s13 = smov %s2439_s14 }
 0x965   : > { %s3381_s14 = smov %s2443_s15  ;;  %s3382_s15 = smov %s2743_s30 }
 0x966   : > { %s3383_s17 = smov %s2459_s19  ;;  %s3384_s18 = smov %s3387_s10 }
 0x967   :  { %31 = sbr.rel (!%p29_p4) target bundleno = 26 (0x1a), region = 130 }
 0x968   : > { %s3385_s19 = smov %s3376_s25 }
 0x96c   :  { %1717 = vsyncpa [#allocation8], 1 }
 0x96d   :  { %1719 = vsyncpa [#allocation8 + $0x1], 1 }
 0x96e   :  { %1720 = vsyncpa [#allocation10], 1 }
 0x96f   :  { %1722 = vsyncpa [#allocation10 + $0x1], 1 }

</bundles_post_ra>
